<compile_context>
chip_gen: v6e
topology: v6e:2x2x1
jax: 0.10.0
libtpu: 0.0.40
codegen_flags: <defaults>
</compile_context>

<pallas_src>
import functools

import jax
import jax.numpy as jnp
from jax import lax
from jax.experimental import pallas as pl
from jax.experimental.pallas import tpu as pltpu


def _ln(x, g, b, eps=1e-5):
    """LayerNorm over the last dim (PyTorch semantics, biased variance)."""
    mu = jnp.mean(x, axis=-1, keepdims=True)
    var = jnp.mean(jnp.square(x - mu), axis=-1, keepdims=True)
    return (x - mu) * lax.rsqrt(var + eps) * g + b


def _slot_attention_kernel(
    # batch-indexed inputs
    inputs_ref, slots0_ref,
    # packed weights
    wq_ref, wkv_ref, wih_ref, whh_ref, gru_b_ref,
    w1_ref, b1_ref, w2_ref,
    ln_in_ref, dpar_ref,
    # outputs (lane-dense, flattened)
    slots_out_ref, attn_out_ref,
    *, iters, eps, scale, tb, n, s, d,
):
    f32 = jnp.float32
    rows = tb * s

    # ---- hoisted, loop-invariant weight loads & broadcasts ----------------
    wq = wq_ref[...]                                   # (D, D)
    wkv = wkv_ref[...]                                 # (Din, 2D)
    w_ih = wih_ref[...]                                # (D, 3D)
    w_hh = whh_ref[...]                                # (D, 3D)
    w1 = w1_ref[...]                                   # (D, H)
    w2 = w2_ref[...]                                   # (H, D)
    hdim = w1.shape[1]
    b_i = jnp.broadcast_to(gru_b_ref[0:1, :], (rows, 3 * d))
    b_h = jnp.broadcast_to(gru_b_ref[1:2, :], (rows, 3 * d))
    b1 = jnp.broadcast_to(b1_ref[...], (rows, hdim))
    g_sl = jnp.broadcast_to(dpar_ref[0:1, :], (rows, d))
    be_sl = jnp.broadcast_to(dpar_ref[1:2, :], (rows, d))
    g_ff = jnp.broadcast_to(dpar_ref[2:3, :], (rows, d))
    be_ff = jnp.broadcast_to(dpar_ref[3:4, :], (rows, d))
    b2 = jnp.broadcast_to(dpar_ref[4:5, :], (rows, d))
    g_in = ln_in_ref[0:1, :]
    be_in = ln_in_ref[1:2, :]

    # ---- input LayerNorm + fused K|V projection (once per grid step) ------
    din = inputs_ref.shape[-1]
    x = inputs_ref[...].astype(f32).reshape(tb * n, din)       # merge leading dims
    x = _ln(x, g_in, be_in)
    kv = jnp.dot(x, wkv, preferred_element_type=f32)           # (TB*N, 2D)
    k = kv[:, 0:d].reshape(tb, n, d)
    v = kv[:, d:2 * d].reshape(tb, n, d)
    kt = jnp.swapaxes(k, 1, 2)                                 # (TB, D, N), transpose hoisted

    slots = slots0_ref[...].astype(f32).reshape(rows, d)       # (TB*S, D)

    for it in range(iters):                                    # small, Python-unrolled
        slots_prev = slots

        sn = _ln(slots, g_sl, be_sl)
        q = jnp.dot(sn, wq, preferred_element_type=f32).reshape(tb, s, d)

        # dots[b, i, j] = <q_bi, k_bj> * scale  -> (TB, S, N)
        dots = lax.dot_general(
            q, kt, dimension_numbers=(((2,), (1,)), ((0,), (0,))),
            preferred_element_type=f32) * scale

        # softmax over the slot axis (axis=1)
        m = jnp.max(dots, axis=1, keepdims=True)
        e = jnp.exp(dots - m)
        soft = e / jnp.sum(e, axis=1, keepdims=True)

        if it == iters - 1:
            # second module output: softmax(dots, slot axis), no recompute
            attn_out_ref[...] = jnp.concatenate(
                [soft[:, i, :] for i in range(s)], axis=-1
            ).astype(attn_out_ref.dtype)

        attn = soft + eps
        attn = attn / jnp.sum(attn, axis=-1, keepdims=True)

        # weighted mean of values: (TB, S, N) @ (TB, N, D) -> (TB, S, D)
        updates = lax.dot_general(
            attn, v, dimension_numbers=(((2,), (1,)), ((0,), (0,))),
            preferred_element_type=f32).reshape(rows, d)

        # ---- GRUCell(updates, slots_prev) with fused gate matmuls ---------
        gi = jnp.dot(updates, w_ih, preferred_element_type=f32) + b_i
        gh = jnp.dot(slots_prev, w_hh, preferred_element_type=f32) + b_h
        r = jax.nn.sigmoid(gi[:, 0:d] + gh[:, 0:d])
        z = jax.nn.sigmoid(gi[:, d:2 * d] + gh[:, d:2 * d])
        ngate = jnp.tanh(gi[:, 2 * d:3 * d] + r * gh[:, 2 * d:3 * d])
        slots = (1.0 - z) * ngate + z * slots_prev

        # ---- residual MLP ---------------------------------------------------
        sf = _ln(slots, g_ff, be_ff)
        h1 = jnp.maximum(jnp.dot(sf, w1, preferred_element_type=f32) + b1, 0.0)
        slots = slots + jnp.dot(h1, w2, preferred_element_type=f32) + b2

    # lane-dense store: (TB, S*D) with S*D == 128 for slot_dim=32
    slots3 = slots.reshape(tb, s, d)
    slots_out_ref[...] = jnp.concatenate(
        [slots3[:, i, :] for i in range(s)], axis=-1).astype(slots_out_ref.dtype)


def slot_attention(inputs, slots0, params, *, iters, eps, slot_dim, block_b=None):
    """Pallas equivalent of SlotAttention.forward.

    inputs: (B, N, in_channels), slots0: (B, num_slots, slot_dim) (already
    sampled with wrapper-side RNG).  Returns (slots, attn) like the module.
    """
    assert iters >= 1, "SlotAttention requires at least one iteration"
    B, N, Din = inputs.shape
    S = slots0.shape[1]
    D = slot_dim
    scale = float(D) ** -0.5

    tb = B if block_b is None else block_b
    assert B % tb == 0, "block_b must divide the batch"
    # Output blocks (tb, S*D)/(tb, S*N) need tb to be a multiple of 8 unless the
    # block covers the whole batch.
    assert tb == B or tb % 8 == 0, "block_b must be 8-aligned or equal to B"
    nb = B // tb

    # ---- pack weights (fewer inputs, fused matmuls) ------------------------
    p = params
    wq = p["wq_t"]                                                     # (D, D)
    wkv = jnp.concatenate([p["wk_t"], p["wv_t"]], axis=1)              # (Din, 2D)
    w_ih = jnp.concatenate([p["wir_t"], p["wiz_t"], p["win_t"]], axis=1)   # (D, 3D)
    w_hh = jnp.concatenate([p["whr_t"], p["whz_t"], p["whn_t"]], axis=1)   # (D, 3D)
    gru_b = jnp.concatenate(
        [jnp.concatenate([p["b_ir"], p["b_iz"], p["b_in"]], axis=1),
         jnp.concatenate([p["b_hr"], p["b_hz"], p["b_hn"]], axis=1)], axis=0)  # (2, 3D)
    w1, b1, w2 = p["w1_t"], p["b1"], p["w2_t"]
    ln_in = jnp.concatenate([p["gamma_in"], p["beta_in"]], axis=0)     # (2, Din)
    dpar = jnp.concatenate([p["gamma_sl"], p["beta_sl"],
                            p["gamma_ff"], p["beta_ff"], p["b2"]], axis=0)  # (5, D)

    weights = [wq, wkv, w_ih, w_hh, gru_b, w1, b1, w2, ln_in, dpar]

    kernel = functools.partial(
        _slot_attention_kernel, iters=iters, eps=float(eps), scale=scale,
        tb=tb, n=N, s=S, d=D)

    def bspec3(dim1, dim2):          # per-batch-block input
        return pl.BlockSpec((tb, dim1, dim2), lambda b: (b, 0, 0))

    def wspec(arr):                  # shared weight, DMA'd once and revisited
        nd = arr.ndim
        return pl.BlockSpec(tuple(arr.shape), lambda b, nd=nd: (0,) * nd)

    in_specs = [bspec3(N, Din), bspec3(S, D)] + [wspec(w) for w in weights]

    out_shape = (jax.ShapeDtypeStruct((B, S * D), jnp.float32),
                 jax.ShapeDtypeStruct((B, S * N), jnp.float32))
    out_specs = (pl.BlockSpec((tb, S * D), lambda b: (b, 0)),
                 pl.BlockSpec((tb, S * N), lambda b: (b, 0)))

    slots_flat, attn_flat = pl.pallas_call(
        kernel,
        out_shape=out_shape,
        grid_spec=pltpu.PrefetchScalarGridSpec(
            num_scalar_prefetch=0,
            grid=(nb,),
            in_specs=in_specs,
            out_specs=out_specs,
        ),
        compiler_params=pltpu.CompilerParams(
            dimension_semantics=("parallel",),
        ),
    )(inputs, slots0, *weights)

    return slots_flat.reshape(B, S, D), attn_flat.reshape(B, S, N)


# --------------------------- pure-JAX reference ----------------------------
def slot_attention_ref(inputs, slots0, p, *, iters, eps, slot_dim):
    def ln(x, g, b):
        mu = jnp.mean(x, axis=-1, keepdims=True)
        var = jnp.mean((x - mu) ** 2, axis=-1, keepdims=True)
        return (x - mu) / jnp.sqrt(var + 1e-5) * g + b

    scale = slot_dim ** -0.5
    x = ln(inputs, p["gamma_in"], p["beta_in"])
    k = x @ p["wk_t"]
    v = x @ p["wv_t"]
    slots = slots0
    dots = None
    for _ in range(iters):
        slots_prev = slots
        sn = ln(slots, p["gamma_sl"], p["beta_sl"])
        q = sn @ p["wq_t"]
        dots = jnp.einsum("bid,bjd->bij", q, k) * scale
        attn = jax.nn.softmax(dots, axis=1) + eps
        attn = attn / jnp.sum(attn, axis=-1, keepdims=True)
        updates = jnp.einsum("bjd,bij->bid", v, attn)
        r = jax.nn.sigmoid(updates @ p["wir_t"] + p["b_ir"]
                           + slots_prev @ p["whr_t"] + p["b_hr"])
        z = jax.nn.sigmoid(updates @ p["wiz_t"] + p["b_iz"]
                           + slots_prev @ p["whz_t"] + p["b_hz"])
        n = jnp.tanh(updates @ p["win_t"] + p["b_in"]
                     + r * (slots_prev @ p["whn_t"] + p["b_hn"]))
        slots = (1.0 - z) * n + z * slots_prev
        sf = ln(slots, p["gamma_ff"], p["beta_ff"])
        h1 = jax.nn.relu(sf @ p["w1_t"] + p["b1"])
        slots = slots + h1 @ p["w2_t"] + p["b2"]
    return slots, jax.nn.softmax(dots, axis=1)


if __name__ == "__main__":
    key = jax.random.PRNGKey(0)
    keys = iter(jax.random.split(key, 48))

    # small shapes consistent with the module
    B, N, Din = 2, 16, 32        # batch, tokens, in_channels
    D, S, H = 32, 4, 128         # slot_dim, num_slots, mlp hidden (=max(32,128))
    iters, eps = 3, 1e-8

    def nrm(shape, s=0.2):
        return jax.random.normal(next(keys), shape, dtype=jnp.float32) * s

    inputs = jax.random.normal(next(keys), (B, N, Din), dtype=jnp.float32)

    # slot init: slots = mu + exp(log_sigma) * noise  (wrapper-side RNG)
    slots_mu = nrm((1, 1, D), 0.5)
    slots_log_sigma = nrm((1, 1, D), 0.5)
    noise = jax.random.normal(next(keys), (B, S, D), dtype=jnp.float32)
    slots0 = slots_mu + jnp.exp(slots_log_sigma) * noise

    params = dict(
        wq_t=nrm((D, D)), wk_t=nrm((Din, D)), wv_t=nrm((Din, D)),
        wir_t=nrm((D, D)), wiz_t=nrm((D, D)), win_t=nrm((D, D)),
        whr_t=nrm((D, D)), whz_t=nrm((D, D)), whn_t=nrm((D, D)),
        # GRU biases are zero-initialized in the module; use small non-zero
        # values here so the forward-pass bias handling is actually tested.
        b_ir=nrm((1, D), 0.05), b_iz=nrm((1, D), 0.05), b_in=nrm((1, D), 0.05),
        b_hr=nrm((1, D), 0.05), b_hz=nrm((1, D), 0.05), b_hn=nrm((1, D), 0.05),
        w1_t=nrm((D, H)), b1=nrm((1, H), 0.05),
        w2_t=nrm((H, D)), b2=nrm((1, D), 0.05),
        gamma_in=jnp.ones((1, Din), jnp.float32),
        beta_in=jnp.zeros((1, Din), jnp.float32),
        gamma_sl=jnp.ones((1, D), jnp.float32),
        beta_sl=jnp.zeros((1, D), jnp.float32),
        gamma_ff=jnp.ones((1, D), jnp.float32),
        beta_ff=jnp.zeros((1, D), jnp.float32),
    )

    slots_k, attn_k = jax.block_until_ready(
        slot_attention(inputs, slots0, params, iters=iters, eps=eps, slot_dim=D))
    slots_r, attn_r = jax.block_until_ready(
        slot_attention_ref(inputs, slots0, params, iters=iters, eps=eps, slot_dim=D))

    err_s = float(jnp.max(jnp.abs(slots_k - slots_r)))
    err_a = float(jnp.max(jnp.abs(attn_k - attn_r)))
    assert jnp.allclose(slots_k, slots_r, rtol=1e-3, atol=1e-3), ("slots", err_s)
    assert jnp.allclose(attn_k, attn_r, rtol=1e-3, atol=1e-3), ("attn", err_a)
    print("KERNEL_OK")
</pallas_src>

<mosaic_0001>
module attributes {stable_mosaic.version = 11 : i64} {
  func.func @_slot_attention_kernel(%arg0: i32, %arg1: memref<2x16x32xf32, #tpu.memory_space<vmem>>, %arg2: memref<2x4x32xf32, #tpu.memory_space<vmem>>, %arg3: memref<32x32xf32, #tpu.memory_space<vmem>>, %arg4: memref<32x64xf32, #tpu.memory_space<vmem>>, %arg5: memref<32x96xf32, #tpu.memory_space<vmem>>, %arg6: memref<32x96xf32, #tpu.memory_space<vmem>>, %arg7: memref<2x96xf32, #tpu.memory_space<vmem>>, %arg8: memref<32x128xf32, #tpu.memory_space<vmem>>, %arg9: memref<1x128xf32, #tpu.memory_space<vmem>>, %arg10: memref<128x32xf32, #tpu.memory_space<vmem>>, %arg11: memref<2x32xf32, #tpu.memory_space<vmem>>, %arg12: memref<5x32xf32, #tpu.memory_space<vmem>>, %arg13: memref<2x128xf32, #tpu.memory_space<vmem>>, %arg14: memref<2x64xf32, #tpu.memory_space<vmem>>) attributes {dimension_semantics = [#tpu.dimension_semantics<parallel>], iteration_bounds = array<i64: 1>, scalar_prefetch = 0 : i64, scratch_operands = 0 : i64, tpu.core_type = #tpu.core_type<tc>, window_params = [{transform_indices = @transform_0, window_bounds = array<i64: 2, 16, 32>}, {transform_indices = @transform_1, window_bounds = array<i64: 2, 4, 32>}, {pipeline_mode = #tpu.pipeline_mode<synchronous>, transform_indices = @transform_2, window_bounds = array<i64: 32, 32>}, {pipeline_mode = #tpu.pipeline_mode<synchronous>, transform_indices = @transform_3, window_bounds = array<i64: 32, 64>}, {pipeline_mode = #tpu.pipeline_mode<synchronous>, transform_indices = @transform_4, window_bounds = array<i64: 32, 96>}, {pipeline_mode = #tpu.pipeline_mode<synchronous>, transform_indices = @transform_5, window_bounds = array<i64: 32, 96>}, {pipeline_mode = #tpu.pipeline_mode<synchronous>, transform_indices = @transform_6, window_bounds = array<i64: 2, 96>}, {pipeline_mode = #tpu.pipeline_mode<synchronous>, transform_indices = @transform_7, window_bounds = array<i64: 32, 128>}, {pipeline_mode = #tpu.pipeline_mode<synchronous>, transform_indices = @transform_8, window_bounds = array<i64: 1, 128>}, {pipeline_mode = #tpu.pipeline_mode<synchronous>, transform_indices = @transform_9, window_bounds = array<i64: 128, 32>}, {pipeline_mode = #tpu.pipeline_mode<synchronous>, transform_indices = @transform_10, window_bounds = array<i64: 2, 32>}, {pipeline_mode = #tpu.pipeline_mode<synchronous>, transform_indices = @transform_11, window_bounds = array<i64: 5, 32>}, {transform_indices = @transform_12, window_bounds = array<i64: 2, 128>}, {transform_indices = @transform_13, window_bounds = array<i64: 2, 64>}]} {
    %c0 = arith.constant 0 : index
    %c0_0 = arith.constant 0 : index
    %0 = vector.load %arg3[%c0, %c0_0] : memref<32x32xf32, #tpu.memory_space<vmem>>, vector<32x32xf32>
    %c0_1 = arith.constant 0 : index
    %c0_2 = arith.constant 0 : index
    %1 = vector.load %arg4[%c0_1, %c0_2] : memref<32x64xf32, #tpu.memory_space<vmem>>, vector<32x64xf32>
    %c0_3 = arith.constant 0 : index
    %c0_4 = arith.constant 0 : index
    %2 = vector.load %arg5[%c0_3, %c0_4] : memref<32x96xf32, #tpu.memory_space<vmem>>, vector<32x96xf32>
    %c0_5 = arith.constant 0 : index
    %c0_6 = arith.constant 0 : index
    %3 = vector.load %arg6[%c0_5, %c0_6] : memref<32x96xf32, #tpu.memory_space<vmem>>, vector<32x96xf32>
    %c0_7 = arith.constant 0 : index
    %c0_8 = arith.constant 0 : index
    %4 = vector.load %arg8[%c0_7, %c0_8] : memref<32x128xf32, #tpu.memory_space<vmem>>, vector<32x128xf32>
    %c0_9 = arith.constant 0 : index
    %c0_10 = arith.constant 0 : index
    %5 = vector.load %arg10[%c0_9, %c0_10] : memref<128x32xf32, #tpu.memory_space<vmem>>, vector<128x32xf32>
    %c0_11 = arith.constant 0 : index
    %c0_12 = arith.constant 0 : index
    %6 = vector.load %arg7[%c0_11, %c0_12] : memref<2x96xf32, #tpu.memory_space<vmem>>, vector<1x96xf32>
    %7 = vector.shape_cast %6 : vector<1x96xf32> to vector<1x96xf32>
    %8 = vector.broadcast %7 : vector<1x96xf32> to vector<8x96xf32>
    %c1 = arith.constant 1 : index
    %c0_13 = arith.constant 0 : index
    %9 = vector.load %arg7[%c1, %c0_13] : memref<2x96xf32, #tpu.memory_space<vmem>>, vector<1x96xf32>
    %10 = vector.shape_cast %9 : vector<1x96xf32> to vector<1x96xf32>
    %11 = vector.broadcast %10 : vector<1x96xf32> to vector<8x96xf32>
    %c0_14 = arith.constant 0 : index
    %c0_15 = arith.constant 0 : index
    %12 = vector.load %arg9[%c0_14, %c0_15] : memref<1x128xf32, #tpu.memory_space<vmem>>, vector<1x128xf32>
    %13 = vector.shape_cast %12 : vector<1x128xf32> to vector<1x128xf32>
    %14 = vector.broadcast %13 : vector<1x128xf32> to vector<8x128xf32>
    %c0_16 = arith.constant 0 : index
    %c0_17 = arith.constant 0 : index
    %15 = vector.load %arg12[%c0_16, %c0_17] : memref<5x32xf32, #tpu.memory_space<vmem>>, vector<1x32xf32>
    %16 = vector.shape_cast %15 : vector<1x32xf32> to vector<1x32xf32>
    %17 = vector.broadcast %16 : vector<1x32xf32> to vector<8x32xf32>
    %c1_18 = arith.constant 1 : index
    %c0_19 = arith.constant 0 : index
    %18 = vector.load %arg12[%c1_18, %c0_19] : memref<5x32xf32, #tpu.memory_space<vmem>>, vector<1x32xf32>
    %19 = vector.shape_cast %18 : vector<1x32xf32> to vector<1x32xf32>
    %20 = vector.broadcast %19 : vector<1x32xf32> to vector<8x32xf32>
    %c2 = arith.constant 2 : index
    %c0_20 = arith.constant 0 : index
    %21 = vector.load %arg12[%c2, %c0_20] : memref<5x32xf32, #tpu.memory_space<vmem>>, vector<1x32xf32>
    %22 = vector.shape_cast %21 : vector<1x32xf32> to vector<1x32xf32>
    %23 = vector.broadcast %22 : vector<1x32xf32> to vector<8x32xf32>
    %c3 = arith.constant 3 : index
    %c0_21 = arith.constant 0 : index
    %24 = vector.load %arg12[%c3, %c0_21] : memref<5x32xf32, #tpu.memory_space<vmem>>, vector<1x32xf32>
    %25 = vector.shape_cast %24 : vector<1x32xf32> to vector<1x32xf32>
    %26 = vector.broadcast %25 : vector<1x32xf32> to vector<8x32xf32>
    %c4 = arith.constant 4 : index
    %c0_22 = arith.constant 0 : index
    %27 = vector.load %arg12[%c4, %c0_22] : memref<5x32xf32, #tpu.memory_space<vmem>>, vector<1x32xf32>
    %28 = vector.shape_cast %27 : vector<1x32xf32> to vector<1x32xf32>
    %29 = vector.broadcast %28 : vector<1x32xf32> to vector<8x32xf32>
    %c0_23 = arith.constant 0 : index
    %c0_24 = arith.constant 0 : index
    %30 = vector.load %arg11[%c0_23, %c0_24] : memref<2x32xf32, #tpu.memory_space<vmem>>, vector<1x32xf32>
    %c1_25 = arith.constant 1 : index
    %c0_26 = arith.constant 0 : index
    %31 = vector.load %arg11[%c1_25, %c0_26] : memref<2x32xf32, #tpu.memory_space<vmem>>, vector<1x32xf32>
    %c0_27 = arith.constant 0 : index
    %c0_28 = arith.constant 0 : index
    %c0_29 = arith.constant 0 : index
    %32 = vector.load %arg1[%c0_27, %c0_28, %c0_29] : memref<2x16x32xf32, #tpu.memory_space<vmem>>, vector<2x16x32xf32>
    %33 = vector.shape_cast %32 : vector<2x16x32xf32> to vector<32x32xf32>
    %cst = arith.constant dense<0.000000e+00> : vector<32xf32>
    %34 = vector.multi_reduction <add>, %33, %cst [1] : vector<32x32xf32> to vector<32xf32>
    %35 = vector.shape_cast %34 : vector<32xf32> to vector<32x1xf32>
    %cst_30 = arith.constant 3.200000e+01 : f32
    %36 = vector.broadcast %cst_30 : f32 to vector<32x1xf32>
    %37 = arith.divf %35, %36 : vector<32x1xf32>
    %38 = vector.broadcast %37 : vector<32x1xf32> to vector<32x32xf32>
    %39 = arith.subf %33, %38 : vector<32x32xf32>
    %40 = arith.mulf %39, %39 : vector<32x32xf32>
    %cst_31 = arith.constant dense<0.000000e+00> : vector<32xf32>
    %41 = vector.multi_reduction <add>, %40, %cst_31 [1] : vector<32x32xf32> to vector<32xf32>
    %42 = vector.shape_cast %41 : vector<32xf32> to vector<32x1xf32>
    %cst_32 = arith.constant 3.200000e+01 : f32
    %43 = vector.broadcast %cst_32 : f32 to vector<32x1xf32>
    %44 = arith.divf %42, %43 : vector<32x1xf32>
    %45 = vector.broadcast %37 : vector<32x1xf32> to vector<32x32xf32>
    %46 = arith.subf %33, %45 : vector<32x32xf32>
    %cst_33 = arith.constant 9.99999974E-6 : f32
    %47 = vector.broadcast %cst_33 : f32 to vector<32x1xf32>
    %48 = arith.addf %44, %47 : vector<32x1xf32>
    %49 = math.rsqrt %48 : vector<32x1xf32>
    %50 = vector.broadcast %49 : vector<32x1xf32> to vector<32x32xf32>
    %51 = arith.mulf %46, %50 : vector<32x32xf32>
    %52 = vector.broadcast %30 : vector<1x32xf32> to vector<32x32xf32>
    %53 = arith.mulf %51, %52 : vector<32x32xf32>
    %54 = vector.broadcast %31 : vector<1x32xf32> to vector<32x32xf32>
    %55 = arith.addf %53, %54 : vector<32x32xf32>
    %cst_34 = arith.constant dense<0.000000e+00> : vector<32x64xf32>
    %56 = tpu.matmul %55, %1, %cst_34 {dimension_numbers = #tpu.dot_dimension_numbers<[1], [0], [0], [1], [0, 0, 1, 1], [], []>} : vector<32x32xf32>, vector<32x64xf32>, vector<32x64xf32> -> vector<32x64xf32>
    %57 = vector.extract_strided_slice %56 {offsets = [0, 0], sizes = [32, 32], strides = [1, 1]} : vector<32x64xf32> to vector<32x32xf32>
    %58 = vector.shape_cast %57 : vector<32x32xf32> to vector<2x16x32xf32>
    %59 = vector.extract_strided_slice %56 {offsets = [0, 32], sizes = [32, 32], strides = [1, 1]} : vector<32x64xf32> to vector<32x32xf32>
    %60 = vector.shape_cast %59 : vector<32x32xf32> to vector<2x16x32xf32>
    %61 = tpu.transpose %58, [0, 2, 1] : vector<2x16x32xf32> -> vector<2x32x16xf32>
    %c0_35 = arith.constant 0 : index
    %c0_36 = arith.constant 0 : index
    %c0_37 = arith.constant 0 : index
    %62 = vector.load %arg2[%c0_35, %c0_36, %c0_37] : memref<2x4x32xf32, #tpu.memory_space<vmem>>, vector<2x4x32xf32>
    %63 = vector.shape_cast %62 : vector<2x4x32xf32> to vector<8x32xf32>
    %cst_38 = arith.constant dense<0.000000e+00> : vector<8xf32>
    %64 = vector.multi_reduction <add>, %63, %cst_38 [1] : vector<8x32xf32> to vector<8xf32>
    %65 = vector.shape_cast %64 : vector<8xf32> to vector<8x1xf32>
    %cst_39 = arith.constant 3.200000e+01 : f32
    %66 = vector.broadcast %cst_39 : f32 to vector<8x1xf32>
    %67 = arith.divf %65, %66 : vector<8x1xf32>
    %68 = vector.broadcast %67 : vector<8x1xf32> to vector<8x32xf32>
    %69 = arith.subf %63, %68 : vector<8x32xf32>
    %70 = arith.mulf %69, %69 : vector<8x32xf32>
    %cst_40 = arith.constant dense<0.000000e+00> : vector<8xf32>
    %71 = vector.multi_reduction <add>, %70, %cst_40 [1] : vector<8x32xf32> to vector<8xf32>
    %72 = vector.shape_cast %71 : vector<8xf32> to vector<8x1xf32>
    %cst_41 = arith.constant 3.200000e+01 : f32
    %73 = vector.broadcast %cst_41 : f32 to vector<8x1xf32>
    %74 = arith.divf %72, %73 : vector<8x1xf32>
    %75 = vector.broadcast %67 : vector<8x1xf32> to vector<8x32xf32>
    %76 = arith.subf %63, %75 : vector<8x32xf32>
    %cst_42 = arith.constant 9.99999974E-6 : f32
    %77 = vector.broadcast %cst_42 : f32 to vector<8x1xf32>
    %78 = arith.addf %74, %77 : vector<8x1xf32>
    %79 = math.rsqrt %78 : vector<8x1xf32>
    %80 = vector.broadcast %79 : vector<8x1xf32> to vector<8x32xf32>
    %81 = arith.mulf %76, %80 : vector<8x32xf32>
    %82 = arith.mulf %81, %17 : vector<8x32xf32>
    %83 = arith.addf %82, %20 : vector<8x32xf32>
    %cst_43 = arith.constant dense<0.000000e+00> : vector<8x32xf32>
    %84 = tpu.matmul %83, %0, %cst_43 {dimension_numbers = #tpu.dot_dimension_numbers<[1], [0], [0], [1], [0, 0, 1, 1], [], []>} : vector<8x32xf32>, vector<32x32xf32>, vector<8x32xf32> -> vector<8x32xf32>
    %85 = vector.shape_cast %84 : vector<8x32xf32> to vector<2x4x32xf32>
    %cst_44 = arith.constant dense<0.000000e+00> : vector<2x4x16xf32>
    %86 = tpu.matmul %85, %61, %cst_44 {dimension_numbers = #tpu.dot_dimension_numbers<[2], [1], [1], [2], [0, 0, 0, 1, 1, 2], [0], [0]>} : vector<2x4x32xf32>, vector<2x32x16xf32>, vector<2x4x16xf32> -> vector<2x4x16xf32>
    %cst_45 = arith.constant 0.176776692 : f32
    %87 = vector.broadcast %cst_45 : f32 to vector<2x4x16xf32>
    %88 = arith.mulf %86, %87 : vector<2x4x16xf32>
    %cst_46 = arith.constant dense<0xFF800000> : vector<2x16xf32>
    %89 = vector.multi_reduction <maximumf>, %88, %cst_46 [1] : vector<2x4x16xf32> to vector<2x16xf32>
    %90 = vector.shape_cast %89 : vector<2x16xf32> to vector<2x1x16xf32>
    %91 = vector.broadcast %90 : vector<2x1x16xf32> to vector<2x4x16xf32>
    %92 = arith.subf %88, %91 : vector<2x4x16xf32>
    %93 = math.exp %92 : vector<2x4x16xf32>
    %cst_47 = arith.constant dense<0.000000e+00> : vector<2x16xf32>
    %94 = vector.multi_reduction <add>, %93, %cst_47 [1] : vector<2x4x16xf32> to vector<2x16xf32>
    %95 = vector.shape_cast %94 : vector<2x16xf32> to vector<2x1x16xf32>
    %96 = vector.broadcast %95 : vector<2x1x16xf32> to vector<2x4x16xf32>
    %97 = arith.divf %93, %96 : vector<2x4x16xf32>
    %cst_48 = arith.constant 9.99999993E-9 : f32
    %98 = vector.broadcast %cst_48 : f32 to vector<2x4x16xf32>
    %99 = arith.addf %97, %98 : vector<2x4x16xf32>
    %cst_49 = arith.constant dense<0.000000e+00> : vector<2x4xf32>
    %100 = vector.multi_reduction <add>, %99, %cst_49 [2] : vector<2x4x16xf32> to vector<2x4xf32>
    %101 = vector.shape_cast %100 : vector<2x4xf32> to vector<2x4x1xf32>
    %102 = vector.broadcast %101 : vector<2x4x1xf32> to vector<2x4x16xf32>
    %103 = arith.divf %99, %102 : vector<2x4x16xf32>
    %cst_50 = arith.constant dense<0.000000e+00> : vector<2x4x32xf32>
    %104 = tpu.matmul %103, %60, %cst_50 {dimension_numbers = #tpu.dot_dimension_numbers<[2], [1], [1], [2], [0, 0, 0, 1, 1, 2], [0], [0]>} : vector<2x4x16xf32>, vector<2x16x32xf32>, vector<2x4x32xf32> -> vector<2x4x32xf32>
    %105 = vector.shape_cast %104 : vector<2x4x32xf32> to vector<8x32xf32>
    %cst_51 = arith.constant dense<0.000000e+00> : vector<8x96xf32>
    %106 = tpu.matmul %105, %2, %cst_51 {dimension_numbers = #tpu.dot_dimension_numbers<[1], [0], [0], [1], [0, 0, 1, 1], [], []>} : vector<8x32xf32>, vector<32x96xf32>, vector<8x96xf32> -> vector<8x96xf32>
    %107 = arith.addf %106, %8 : vector<8x96xf32>
    %cst_52 = arith.constant dense<0.000000e+00> : vector<8x96xf32>
    %108 = tpu.matmul %63, %3, %cst_52 {dimension_numbers = #tpu.dot_dimension_numbers<[1], [0], [0], [1], [0, 0, 1, 1], [], []>} : vector<8x32xf32>, vector<32x96xf32>, vector<8x96xf32> -> vector<8x96xf32>
    %109 = arith.addf %108, %11 : vector<8x96xf32>
    %110 = vector.extract_strided_slice %107 {offsets = [0, 0], sizes = [8, 32], strides = [1, 1]} : vector<8x96xf32> to vector<8x32xf32>
    %111 = vector.extract_strided_slice %109 {offsets = [0, 0], sizes = [8, 32], strides = [1, 1]} : vector<8x96xf32> to vector<8x32xf32>
    %112 = arith.addf %110, %111 : vector<8x32xf32>
    %113 = arith.negf %112 : vector<8x32xf32>
    %114 = math.exp %113 : vector<8x32xf32>
    %cst_53 = arith.constant 1.000000e+00 : f32
    %115 = vector.broadcast %cst_53 : f32 to vector<8x32xf32>
    %116 = arith.addf %115, %114 : vector<8x32xf32>
    %117 = arith.divf %115, %116 : vector<8x32xf32>
    %118 = vector.extract_strided_slice %107 {offsets = [0, 32], sizes = [8, 32], strides = [1, 1]} : vector<8x96xf32> to vector<8x32xf32>
    %119 = vector.extract_strided_slice %109 {offsets = [0, 32], sizes = [8, 32], strides = [1, 1]} : vector<8x96xf32> to vector<8x32xf32>
    %120 = arith.addf %118, %119 : vector<8x32xf32>
    %121 = arith.negf %120 : vector<8x32xf32>
    %122 = math.exp %121 : vector<8x32xf32>
    %cst_54 = arith.constant 1.000000e+00 : f32
    %123 = vector.broadcast %cst_54 : f32 to vector<8x32xf32>
    %124 = arith.addf %123, %122 : vector<8x32xf32>
    %125 = arith.divf %123, %124 : vector<8x32xf32>
    %126 = vector.extract_strided_slice %107 {offsets = [0, 64], sizes = [8, 32], strides = [1, 1]} : vector<8x96xf32> to vector<8x32xf32>
    %127 = vector.extract_strided_slice %109 {offsets = [0, 64], sizes = [8, 32], strides = [1, 1]} : vector<8x96xf32> to vector<8x32xf32>
    %128 = arith.mulf %117, %127 : vector<8x32xf32>
    %129 = arith.addf %126, %128 : vector<8x32xf32>
    %130 = math.tanh %129 : vector<8x32xf32>
    %cst_55 = arith.constant 1.000000e+00 : f32
    %131 = vector.broadcast %cst_55 : f32 to vector<8x32xf32>
    %132 = arith.subf %131, %125 : vector<8x32xf32>
    %133 = arith.mulf %132, %130 : vector<8x32xf32>
    %134 = arith.mulf %125, %63 : vector<8x32xf32>
    %135 = arith.addf %133, %134 : vector<8x32xf32>
    %cst_56 = arith.constant dense<0.000000e+00> : vector<8xf32>
    %136 = vector.multi_reduction <add>, %135, %cst_56 [1] : vector<8x32xf32> to vector<8xf32>
    %137 = vector.shape_cast %136 : vector<8xf32> to vector<8x1xf32>
    %cst_57 = arith.constant 3.200000e+01 : f32
    %138 = vector.broadcast %cst_57 : f32 to vector<8x1xf32>
    %139 = arith.divf %137, %138 : vector<8x1xf32>
    %140 = vector.broadcast %139 : vector<8x1xf32> to vector<8x32xf32>
    %141 = arith.subf %135, %140 : vector<8x32xf32>
    %142 = arith.mulf %141, %141 : vector<8x32xf32>
    %cst_58 = arith.constant dense<0.000000e+00> : vector<8xf32>
    %143 = vector.multi_reduction <add>, %142, %cst_58 [1] : vector<8x32xf32> to vector<8xf32>
    %144 = vector.shape_cast %143 : vector<8xf32> to vector<8x1xf32>
    %cst_59 = arith.constant 3.200000e+01 : f32
    %145 = vector.broadcast %cst_59 : f32 to vector<8x1xf32>
    %146 = arith.divf %144, %145 : vector<8x1xf32>
    %147 = vector.broadcast %139 : vector<8x1xf32> to vector<8x32xf32>
    %148 = arith.subf %135, %147 : vector<8x32xf32>
    %cst_60 = arith.constant 9.99999974E-6 : f32
    %149 = vector.broadcast %cst_60 : f32 to vector<8x1xf32>
    %150 = arith.addf %146, %149 : vector<8x1xf32>
    %151 = math.rsqrt %150 : vector<8x1xf32>
    %152 = vector.broadcast %151 : vector<8x1xf32> to vector<8x32xf32>
    %153 = arith.mulf %148, %152 : vector<8x32xf32>
    %154 = arith.mulf %153, %23 : vector<8x32xf32>
    %155 = arith.addf %154, %26 : vector<8x32xf32>
    %cst_61 = arith.constant dense<0.000000e+00> : vector<8x128xf32>
    %156 = tpu.matmul %155, %4, %cst_61 {dimension_numbers = #tpu.dot_dimension_numbers<[1], [0], [0], [1], [0, 0, 1, 1], [], []>} : vector<8x32xf32>, vector<32x128xf32>, vector<8x128xf32> -> vector<8x128xf32>
    %157 = arith.addf %156, %14 : vector<8x128xf32>
    %cst_62 = arith.constant 0.000000e+00 : f32
    %158 = vector.broadcast %cst_62 : f32 to vector<8x128xf32>
    %159 = arith.maximumf %157, %158 : vector<8x128xf32>
    %cst_63 = arith.constant dense<0.000000e+00> : vector<8x32xf32>
    %160 = tpu.matmul %159, %5, %cst_63 {dimension_numbers = #tpu.dot_dimension_numbers<[1], [0], [0], [1], [0, 0, 1, 1], [], []>} : vector<8x128xf32>, vector<128x32xf32>, vector<8x32xf32> -> vector<8x32xf32>
    %161 = arith.addf %135, %160 : vector<8x32xf32>
    %162 = arith.addf %161, %29 : vector<8x32xf32>
    %cst_64 = arith.constant dense<0.000000e+00> : vector<8xf32>
    %163 = vector.multi_reduction <add>, %162, %cst_64 [1] : vector<8x32xf32> to vector<8xf32>
    %164 = vector.shape_cast %163 : vector<8xf32> to vector<8x1xf32>
    %cst_65 = arith.constant 3.200000e+01 : f32
    %165 = vector.broadcast %cst_65 : f32 to vector<8x1xf32>
    %166 = arith.divf %164, %165 : vector<8x1xf32>
    %167 = vector.broadcast %166 : vector<8x1xf32> to vector<8x32xf32>
    %168 = arith.subf %162, %167 : vector<8x32xf32>
    %169 = arith.mulf %168, %168 : vector<8x32xf32>
    %cst_66 = arith.constant dense<0.000000e+00> : vector<8xf32>
    %170 = vector.multi_reduction <add>, %169, %cst_66 [1] : vector<8x32xf32> to vector<8xf32>
    %171 = vector.shape_cast %170 : vector<8xf32> to vector<8x1xf32>
    %cst_67 = arith.constant 3.200000e+01 : f32
    %172 = vector.broadcast %cst_67 : f32 to vector<8x1xf32>
    %173 = arith.divf %171, %172 : vector<8x1xf32>
    %174 = vector.broadcast %166 : vector<8x1xf32> to vector<8x32xf32>
    %175 = arith.subf %162, %174 : vector<8x32xf32>
    %cst_68 = arith.constant 9.99999974E-6 : f32
    %176 = vector.broadcast %cst_68 : f32 to vector<8x1xf32>
    %177 = arith.addf %173, %176 : vector<8x1xf32>
    %178 = math.rsqrt %177 : vector<8x1xf32>
    %179 = vector.broadcast %178 : vector<8x1xf32> to vector<8x32xf32>
    %180 = arith.mulf %175, %179 : vector<8x32xf32>
    %181 = arith.mulf %180, %17 : vector<8x32xf32>
    %182 = arith.addf %181, %20 : vector<8x32xf32>
    %cst_69 = arith.constant dense<0.000000e+00> : vector<8x32xf32>
    %183 = tpu.matmul %182, %0, %cst_69 {dimension_numbers = #tpu.dot_dimension_numbers<[1], [0], [0], [1], [0, 0, 1, 1], [], []>} : vector<8x32xf32>, vector<32x32xf32>, vector<8x32xf32> -> vector<8x32xf32>
    %184 = vector.shape_cast %183 : vector<8x32xf32> to vector<2x4x32xf32>
    %cst_70 = arith.constant dense<0.000000e+00> : vector<2x4x16xf32>
    %185 = tpu.matmul %184, %61, %cst_70 {dimension_numbers = #tpu.dot_dimension_numbers<[2], [1], [1], [2], [0, 0, 0, 1, 1, 2], [0], [0]>} : vector<2x4x32xf32>, vector<2x32x16xf32>, vector<2x4x16xf32> -> vector<2x4x16xf32>
    %cst_71 = arith.constant 0.176776692 : f32
    %186 = vector.broadcast %cst_71 : f32 to vector<2x4x16xf32>
    %187 = arith.mulf %185, %186 : vector<2x4x16xf32>
    %cst_72 = arith.constant dense<0xFF800000> : vector<2x16xf32>
    %188 = vector.multi_reduction <maximumf>, %187, %cst_72 [1] : vector<2x4x16xf32> to vector<2x16xf32>
    %189 = vector.shape_cast %188 : vector<2x16xf32> to vector<2x1x16xf32>
    %190 = vector.broadcast %189 : vector<2x1x16xf32> to vector<2x4x16xf32>
    %191 = arith.subf %187, %190 : vector<2x4x16xf32>
    %192 = math.exp %191 : vector<2x4x16xf32>
    %cst_73 = arith.constant dense<0.000000e+00> : vector<2x16xf32>
    %193 = vector.multi_reduction <add>, %192, %cst_73 [1] : vector<2x4x16xf32> to vector<2x16xf32>
    %194 = vector.shape_cast %193 : vector<2x16xf32> to vector<2x1x16xf32>
    %195 = vector.broadcast %194 : vector<2x1x16xf32> to vector<2x4x16xf32>
    %196 = arith.divf %192, %195 : vector<2x4x16xf32>
    %cst_74 = arith.constant 9.99999993E-9 : f32
    %197 = vector.broadcast %cst_74 : f32 to vector<2x4x16xf32>
    %198 = arith.addf %196, %197 : vector<2x4x16xf32>
    %cst_75 = arith.constant dense<0.000000e+00> : vector<2x4xf32>
    %199 = vector.multi_reduction <add>, %198, %cst_75 [2] : vector<2x4x16xf32> to vector<2x4xf32>
    %200 = vector.shape_cast %199 : vector<2x4xf32> to vector<2x4x1xf32>
    %201 = vector.broadcast %200 : vector<2x4x1xf32> to vector<2x4x16xf32>
    %202 = arith.divf %198, %201 : vector<2x4x16xf32>
    %cst_76 = arith.constant dense<0.000000e+00> : vector<2x4x32xf32>
    %203 = tpu.matmul %202, %60, %cst_76 {dimension_numbers = #tpu.dot_dimension_numbers<[2], [1], [1], [2], [0, 0, 0, 1, 1, 2], [0], [0]>} : vector<2x4x16xf32>, vector<2x16x32xf32>, vector<2x4x32xf32> -> vector<2x4x32xf32>
    %204 = vector.shape_cast %203 : vector<2x4x32xf32> to vector<8x32xf32>
    %cst_77 = arith.constant dense<0.000000e+00> : vector<8x96xf32>
    %205 = tpu.matmul %204, %2, %cst_77 {dimension_numbers = #tpu.dot_dimension_numbers<[1], [0], [0], [1], [0, 0, 1, 1], [], []>} : vector<8x32xf32>, vector<32x96xf32>, vector<8x96xf32> -> vector<8x96xf32>
    %206 = arith.addf %205, %8 : vector<8x96xf32>
    %cst_78 = arith.constant dense<0.000000e+00> : vector<8x96xf32>
    %207 = tpu.matmul %162, %3, %cst_78 {dimension_numbers = #tpu.dot_dimension_numbers<[1], [0], [0], [1], [0, 0, 1, 1], [], []>} : vector<8x32xf32>, vector<32x96xf32>, vector<8x96xf32> -> vector<8x96xf32>
    %208 = arith.addf %207, %11 : vector<8x96xf32>
    %209 = vector.extract_strided_slice %206 {offsets = [0, 0], sizes = [8, 32], strides = [1, 1]} : vector<8x96xf32> to vector<8x32xf32>
    %210 = vector.extract_strided_slice %208 {offsets = [0, 0], sizes = [8, 32], strides = [1, 1]} : vector<8x96xf32> to vector<8x32xf32>
    %211 = arith.addf %209, %210 : vector<8x32xf32>
    %212 = arith.negf %211 : vector<8x32xf32>
    %213 = math.exp %212 : vector<8x32xf32>
    %cst_79 = arith.constant 1.000000e+00 : f32
    %214 = vector.broadcast %cst_79 : f32 to vector<8x32xf32>
    %215 = arith.addf %214, %213 : vector<8x32xf32>
    %216 = arith.divf %214, %215 : vector<8x32xf32>
    %217 = vector.extract_strided_slice %206 {offsets = [0, 32], sizes = [8, 32], strides = [1, 1]} : vector<8x96xf32> to vector<8x32xf32>
    %218 = vector.extract_strided_slice %208 {offsets = [0, 32], sizes = [8, 32], strides = [1, 1]} : vector<8x96xf32> to vector<8x32xf32>
    %219 = arith.addf %217, %218 : vector<8x32xf32>
    %220 = arith.negf %219 : vector<8x32xf32>
    %221 = math.exp %220 : vector<8x32xf32>
    %cst_80 = arith.constant 1.000000e+00 : f32
    %222 = vector.broadcast %cst_80 : f32 to vector<8x32xf32>
    %223 = arith.addf %222, %221 : vector<8x32xf32>
    %224 = arith.divf %222, %223 : vector<8x32xf32>
    %225 = vector.extract_strided_slice %206 {offsets = [0, 64], sizes = [8, 32], strides = [1, 1]} : vector<8x96xf32> to vector<8x32xf32>
    %226 = vector.extract_strided_slice %208 {offsets = [0, 64], sizes = [8, 32], strides = [1, 1]} : vector<8x96xf32> to vector<8x32xf32>
    %227 = arith.mulf %216, %226 : vector<8x32xf32>
    %228 = arith.addf %225, %227 : vector<8x32xf32>
    %229 = math.tanh %228 : vector<8x32xf32>
    %cst_81 = arith.constant 1.000000e+00 : f32
    %230 = vector.broadcast %cst_81 : f32 to vector<8x32xf32>
    %231 = arith.subf %230, %224 : vector<8x32xf32>
    %232 = arith.mulf %231, %229 : vector<8x32xf32>
    %233 = arith.mulf %224, %162 : vector<8x32xf32>
    %234 = arith.addf %232, %233 : vector<8x32xf32>
    %cst_82 = arith.constant dense<0.000000e+00> : vector<8xf32>
    %235 = vector.multi_reduction <add>, %234, %cst_82 [1] : vector<8x32xf32> to vector<8xf32>
    %236 = vector.shape_cast %235 : vector<8xf32> to vector<8x1xf32>
    %cst_83 = arith.constant 3.200000e+01 : f32
    %237 = vector.broadcast %cst_83 : f32 to vector<8x1xf32>
    %238 = arith.divf %236, %237 : vector<8x1xf32>
    %239 = vector.broadcast %238 : vector<8x1xf32> to vector<8x32xf32>
    %240 = arith.subf %234, %239 : vector<8x32xf32>
    %241 = arith.mulf %240, %240 : vector<8x32xf32>
    %cst_84 = arith.constant dense<0.000000e+00> : vector<8xf32>
    %242 = vector.multi_reduction <add>, %241, %cst_84 [1] : vector<8x32xf32> to vector<8xf32>
    %243 = vector.shape_cast %242 : vector<8xf32> to vector<8x1xf32>
    %cst_85 = arith.constant 3.200000e+01 : f32
    %244 = vector.broadcast %cst_85 : f32 to vector<8x1xf32>
    %245 = arith.divf %243, %244 : vector<8x1xf32>
    %246 = vector.broadcast %238 : vector<8x1xf32> to vector<8x32xf32>
    %247 = arith.subf %234, %246 : vector<8x32xf32>
    %cst_86 = arith.constant 9.99999974E-6 : f32
    %248 = vector.broadcast %cst_86 : f32 to vector<8x1xf32>
    %249 = arith.addf %245, %248 : vector<8x1xf32>
    %250 = math.rsqrt %249 : vector<8x1xf32>
    %251 = vector.broadcast %250 : vector<8x1xf32> to vector<8x32xf32>
    %252 = arith.mulf %247, %251 : vector<8x32xf32>
    %253 = arith.mulf %252, %23 : vector<8x32xf32>
    %254 = arith.addf %253, %26 : vector<8x32xf32>
    %cst_87 = arith.constant dense<0.000000e+00> : vector<8x128xf32>
    %255 = tpu.matmul %254, %4, %cst_87 {dimension_numbers = #tpu.dot_dimension_numbers<[1], [0], [0], [1], [0, 0, 1, 1], [], []>} : vector<8x32xf32>, vector<32x128xf32>, vector<8x128xf32> -> vector<8x128xf32>
    %256 = arith.addf %255, %14 : vector<8x128xf32>
    %cst_88 = arith.constant 0.000000e+00 : f32
    %257 = vector.broadcast %cst_88 : f32 to vector<8x128xf32>
    %258 = arith.maximumf %256, %257 : vector<8x128xf32>
    %cst_89 = arith.constant dense<0.000000e+00> : vector<8x32xf32>
    %259 = tpu.matmul %258, %5, %cst_89 {dimension_numbers = #tpu.dot_dimension_numbers<[1], [0], [0], [1], [0, 0, 1, 1], [], []>} : vector<8x128xf32>, vector<128x32xf32>, vector<8x32xf32> -> vector<8x32xf32>
    %260 = arith.addf %234, %259 : vector<8x32xf32>
    %261 = arith.addf %260, %29 : vector<8x32xf32>
    %cst_90 = arith.constant dense<0.000000e+00> : vector<8xf32>
    %262 = vector.multi_reduction <add>, %261, %cst_90 [1] : vector<8x32xf32> to vector<8xf32>
    %263 = vector.shape_cast %262 : vector<8xf32> to vector<8x1xf32>
    %cst_91 = arith.constant 3.200000e+01 : f32
    %264 = vector.broadcast %cst_91 : f32 to vector<8x1xf32>
    %265 = arith.divf %263, %264 : vector<8x1xf32>
    %266 = vector.broadcast %265 : vector<8x1xf32> to vector<8x32xf32>
    %267 = arith.subf %261, %266 : vector<8x32xf32>
    %268 = arith.mulf %267, %267 : vector<8x32xf32>
    %cst_92 = arith.constant dense<0.000000e+00> : vector<8xf32>
    %269 = vector.multi_reduction <add>, %268, %cst_92 [1] : vector<8x32xf32> to vector<8xf32>
    %270 = vector.shape_cast %269 : vector<8xf32> to vector<8x1xf32>
    %cst_93 = arith.constant 3.200000e+01 : f32
    %271 = vector.broadcast %cst_93 : f32 to vector<8x1xf32>
    %272 = arith.divf %270, %271 : vector<8x1xf32>
    %273 = vector.broadcast %265 : vector<8x1xf32> to vector<8x32xf32>
    %274 = arith.subf %261, %273 : vector<8x32xf32>
    %cst_94 = arith.constant 9.99999974E-6 : f32
    %275 = vector.broadcast %cst_94 : f32 to vector<8x1xf32>
    %276 = arith.addf %272, %275 : vector<8x1xf32>
    %277 = math.rsqrt %276 : vector<8x1xf32>
    %278 = vector.broadcast %277 : vector<8x1xf32> to vector<8x32xf32>
    %279 = arith.mulf %274, %278 : vector<8x32xf32>
    %280 = arith.mulf %279, %17 : vector<8x32xf32>
    %281 = arith.addf %280, %20 : vector<8x32xf32>
    %cst_95 = arith.constant dense<0.000000e+00> : vector<8x32xf32>
    %282 = tpu.matmul %281, %0, %cst_95 {dimension_numbers = #tpu.dot_dimension_numbers<[1], [0], [0], [1], [0, 0, 1, 1], [], []>} : vector<8x32xf32>, vector<32x32xf32>, vector<8x32xf32> -> vector<8x32xf32>
    %283 = vector.shape_cast %282 : vector<8x32xf32> to vector<2x4x32xf32>
    %cst_96 = arith.constant dense<0.000000e+00> : vector<2x4x16xf32>
    %284 = tpu.matmul %283, %61, %cst_96 {dimension_numbers = #tpu.dot_dimension_numbers<[2], [1], [1], [2], [0, 0, 0, 1, 1, 2], [0], [0]>} : vector<2x4x32xf32>, vector<2x32x16xf32>, vector<2x4x16xf32> -> vector<2x4x16xf32>
    %cst_97 = arith.constant 0.176776692 : f32
    %285 = vector.broadcast %cst_97 : f32 to vector<2x4x16xf32>
    %286 = arith.mulf %284, %285 : vector<2x4x16xf32>
    %cst_98 = arith.constant dense<0xFF800000> : vector<2x16xf32>
    %287 = vector.multi_reduction <maximumf>, %286, %cst_98 [1] : vector<2x4x16xf32> to vector<2x16xf32>
    %288 = vector.shape_cast %287 : vector<2x16xf32> to vector<2x1x16xf32>
    %289 = vector.broadcast %288 : vector<2x1x16xf32> to vector<2x4x16xf32>
    %290 = arith.subf %286, %289 : vector<2x4x16xf32>
    %291 = math.exp %290 : vector<2x4x16xf32>
    %cst_99 = arith.constant dense<0.000000e+00> : vector<2x16xf32>
    %292 = vector.multi_reduction <add>, %291, %cst_99 [1] : vector<2x4x16xf32> to vector<2x16xf32>
    %293 = vector.shape_cast %292 : vector<2x16xf32> to vector<2x1x16xf32>
    %294 = vector.broadcast %293 : vector<2x1x16xf32> to vector<2x4x16xf32>
    %295 = arith.divf %291, %294 : vector<2x4x16xf32>
    %296 = vector.extract_strided_slice %295 {offsets = [0, 0, 0], sizes = [2, 1, 16], strides = [1, 1, 1]} : vector<2x4x16xf32> to vector<2x1x16xf32>
    %297 = vector.shape_cast %296 : vector<2x1x16xf32> to vector<2x16xf32>
    %298 = vector.extract_strided_slice %295 {offsets = [0, 1, 0], sizes = [2, 1, 16], strides = [1, 1, 1]} : vector<2x4x16xf32> to vector<2x1x16xf32>
    %299 = vector.shape_cast %298 : vector<2x1x16xf32> to vector<2x16xf32>
    %300 = vector.extract_strided_slice %295 {offsets = [0, 2, 0], sizes = [2, 1, 16], strides = [1, 1, 1]} : vector<2x4x16xf32> to vector<2x1x16xf32>
    %301 = vector.shape_cast %300 : vector<2x1x16xf32> to vector<2x16xf32>
    %302 = vector.extract_strided_slice %295 {offsets = [0, 3, 0], sizes = [2, 1, 16], strides = [1, 1, 1]} : vector<2x4x16xf32> to vector<2x1x16xf32>
    %303 = vector.shape_cast %302 : vector<2x1x16xf32> to vector<2x16xf32>
    %304 = tpu.concatenate %297, %299, %301, %303 in 1 : vector<2x16xf32>, vector<2x16xf32>, vector<2x16xf32>, vector<2x16xf32> -> vector<2x64xf32>
    %c0_100 = arith.constant 0 : index
    %c0_101 = arith.constant 0 : index
    %305 = vector.load %arg14[%c0_100, %c0_101] : memref<2x64xf32, #tpu.memory_space<vmem>>, vector<2x64xf32>
    tpu.vector_store %arg14[%c0_100, %c0_101], %304 {strides = array<i32>} : memref<2x64xf32, #tpu.memory_space<vmem>>, vector<2x64xf32>,
    %cst_102 = arith.constant 9.99999993E-9 : f32
    %306 = vector.broadcast %cst_102 : f32 to vector<2x4x16xf32>
    %307 = arith.addf %295, %306 : vector<2x4x16xf32>
    %cst_103 = arith.constant dense<0.000000e+00> : vector<2x4xf32>
    %308 = vector.multi_reduction <add>, %307, %cst_103 [2] : vector<2x4x16xf32> to vector<2x4xf32>
    %309 = vector.shape_cast %308 : vector<2x4xf32> to vector<2x4x1xf32>
    %310 = vector.broadcast %309 : vector<2x4x1xf32> to vector<2x4x16xf32>
    %311 = arith.divf %307, %310 : vector<2x4x16xf32>
    %cst_104 = arith.constant dense<0.000000e+00> : vector<2x4x32xf32>
    %312 = tpu.matmul %311, %60, %cst_104 {dimension_numbers = #tpu.dot_dimension_numbers<[2], [1], [1], [2], [0, 0, 0, 1, 1, 2], [0], [0]>} : vector<2x4x16xf32>, vector<2x16x32xf32>, vector<2x4x32xf32> -> vector<2x4x32xf32>
    %313 = vector.shape_cast %312 : vector<2x4x32xf32> to vector<8x32xf32>
    %cst_105 = arith.constant dense<0.000000e+00> : vector<8x96xf32>
    %314 = tpu.matmul %313, %2, %cst_105 {dimension_numbers = #tpu.dot_dimension_numbers<[1], [0], [0], [1], [0, 0, 1, 1], [], []>} : vector<8x32xf32>, vector<32x96xf32>, vector<8x96xf32> -> vector<8x96xf32>
    %315 = arith.addf %314, %8 : vector<8x96xf32>
    %cst_106 = arith.constant dense<0.000000e+00> : vector<8x96xf32>
    %316 = tpu.matmul %261, %3, %cst_106 {dimension_numbers = #tpu.dot_dimension_numbers<[1], [0], [0], [1], [0, 0, 1, 1], [], []>} : vector<8x32xf32>, vector<32x96xf32>, vector<8x96xf32> -> vector<8x96xf32>
    %317 = arith.addf %316, %11 : vector<8x96xf32>
    %318 = vector.extract_strided_slice %315 {offsets = [0, 0], sizes = [8, 32], strides = [1, 1]} : vector<8x96xf32> to vector<8x32xf32>
    %319 = vector.extract_strided_slice %317 {offsets = [0, 0], sizes = [8, 32], strides = [1, 1]} : vector<8x96xf32> to vector<8x32xf32>
    %320 = arith.addf %318, %319 : vector<8x32xf32>
    %321 = arith.negf %320 : vector<8x32xf32>
    %322 = math.exp %321 : vector<8x32xf32>
    %cst_107 = arith.constant 1.000000e+00 : f32
    %323 = vector.broadcast %cst_107 : f32 to vector<8x32xf32>
    %324 = arith.addf %323, %322 : vector<8x32xf32>
    %325 = arith.divf %323, %324 : vector<8x32xf32>
    %326 = vector.extract_strided_slice %315 {offsets = [0, 32], sizes = [8, 32], strides = [1, 1]} : vector<8x96xf32> to vector<8x32xf32>
    %327 = vector.extract_strided_slice %317 {offsets = [0, 32], sizes = [8, 32], strides = [1, 1]} : vector<8x96xf32> to vector<8x32xf32>
    %328 = arith.addf %326, %327 : vector<8x32xf32>
    %329 = arith.negf %328 : vector<8x32xf32>
    %330 = math.exp %329 : vector<8x32xf32>
    %cst_108 = arith.constant 1.000000e+00 : f32
    %331 = vector.broadcast %cst_108 : f32 to vector<8x32xf32>
    %332 = arith.addf %331, %330 : vector<8x32xf32>
    %333 = arith.divf %331, %332 : vector<8x32xf32>
    %334 = vector.extract_strided_slice %315 {offsets = [0, 64], sizes = [8, 32], strides = [1, 1]} : vector<8x96xf32> to vector<8x32xf32>
    %335 = vector.extract_strided_slice %317 {offsets = [0, 64], sizes = [8, 32], strides = [1, 1]} : vector<8x96xf32> to vector<8x32xf32>
    %336 = arith.mulf %325, %335 : vector<8x32xf32>
    %337 = arith.addf %334, %336 : vector<8x32xf32>
    %338 = math.tanh %337 : vector<8x32xf32>
    %cst_109 = arith.constant 1.000000e+00 : f32
    %339 = vector.broadcast %cst_109 : f32 to vector<8x32xf32>
    %340 = arith.subf %339, %333 : vector<8x32xf32>
    %341 = arith.mulf %340, %338 : vector<8x32xf32>
    %342 = arith.mulf %333, %261 : vector<8x32xf32>
    %343 = arith.addf %341, %342 : vector<8x32xf32>
    %cst_110 = arith.constant dense<0.000000e+00> : vector<8xf32>
    %344 = vector.multi_reduction <add>, %343, %cst_110 [1] : vector<8x32xf32> to vector<8xf32>
    %345 = vector.shape_cast %344 : vector<8xf32> to vector<8x1xf32>
    %cst_111 = arith.constant 3.200000e+01 : f32
    %346 = vector.broadcast %cst_111 : f32 to vector<8x1xf32>
    %347 = arith.divf %345, %346 : vector<8x1xf32>
    %348 = vector.broadcast %347 : vector<8x1xf32> to vector<8x32xf32>
    %349 = arith.subf %343, %348 : vector<8x32xf32>
    %350 = arith.mulf %349, %349 : vector<8x32xf32>
    %cst_112 = arith.constant dense<0.000000e+00> : vector<8xf32>
    %351 = vector.multi_reduction <add>, %350, %cst_112 [1] : vector<8x32xf32> to vector<8xf32>
    %352 = vector.shape_cast %351 : vector<8xf32> to vector<8x1xf32>
    %cst_113 = arith.constant 3.200000e+01 : f32
    %353 = vector.broadcast %cst_113 : f32 to vector<8x1xf32>
    %354 = arith.divf %352, %353 : vector<8x1xf32>
    %355 = vector.broadcast %347 : vector<8x1xf32> to vector<8x32xf32>
    %356 = arith.subf %343, %355 : vector<8x32xf32>
    %cst_114 = arith.constant 9.99999974E-6 : f32
    %357 = vector.broadcast %cst_114 : f32 to vector<8x1xf32>
    %358 = arith.addf %354, %357 : vector<8x1xf32>
    %359 = math.rsqrt %358 : vector<8x1xf32>
    %360 = vector.broadcast %359 : vector<8x1xf32> to vector<8x32xf32>
    %361 = arith.mulf %356, %360 : vector<8x32xf32>
    %362 = arith.mulf %361, %23 : vector<8x32xf32>
    %363 = arith.addf %362, %26 : vector<8x32xf32>
    %cst_115 = arith.constant dense<0.000000e+00> : vector<8x128xf32>
    %364 = tpu.matmul %363, %4, %cst_115 {dimension_numbers = #tpu.dot_dimension_numbers<[1], [0], [0], [1], [0, 0, 1, 1], [], []>} : vector<8x32xf32>, vector<32x128xf32>, vector<8x128xf32> -> vector<8x128xf32>
    %365 = arith.addf %364, %14 : vector<8x128xf32>
    %cst_116 = arith.constant 0.000000e+00 : f32
    %366 = vector.broadcast %cst_116 : f32 to vector<8x128xf32>
    %367 = arith.maximumf %365, %366 : vector<8x128xf32>
    %cst_117 = arith.constant dense<0.000000e+00> : vector<8x32xf32>
    %368 = tpu.matmul %367, %5, %cst_117 {dimension_numbers = #tpu.dot_dimension_numbers<[1], [0], [0], [1], [0, 0, 1, 1], [], []>} : vector<8x128xf32>, vector<128x32xf32>, vector<8x32xf32> -> vector<8x32xf32>
    %369 = arith.addf %343, %368 : vector<8x32xf32>
    %370 = arith.addf %369, %29 : vector<8x32xf32>
    %371 = vector.shape_cast %370 : vector<8x32xf32> to vector<2x4x32xf32>
    %372 = vector.extract_strided_slice %371 {offsets = [0, 0, 0], sizes = [2, 1, 32], strides = [1, 1, 1]} : vector<2x4x32xf32> to vector<2x1x32xf32>
    %373 = vector.shape_cast %372 : vector<2x1x32xf32> to vector<2x32xf32>
    %374 = vector.extract_strided_slice %371 {offsets = [0, 1, 0], sizes = [2, 1, 32], strides = [1, 1, 1]} : vector<2x4x32xf32> to vector<2x1x32xf32>
    %375 = vector.shape_cast %374 : vector<2x1x32xf32> to vector<2x32xf32>
    %376 = vector.extract_strided_slice %371 {offsets = [0, 2, 0], sizes = [2, 1, 32], strides = [1, 1, 1]} : vector<2x4x32xf32> to vector<2x1x32xf32>
    %377 = vector.shape_cast %376 : vector<2x1x32xf32> to vector<2x32xf32>
    %378 = vector.extract_strided_slice %371 {offsets = [0, 3, 0], sizes = [2, 1, 32], strides = [1, 1, 1]} : vector<2x4x32xf32> to vector<2x1x32xf32>
    %379 = vector.shape_cast %378 : vector<2x1x32xf32> to vector<2x32xf32>
    %380 = tpu.concatenate %373, %375, %377, %379 in 1 : vector<2x32xf32>, vector<2x32xf32>, vector<2x32xf32>, vector<2x32xf32> -> vector<2x128xf32>
    %c0_118 = arith.constant 0 : index
    %c0_119 = arith.constant 0 : index
    %381 = vector.load %arg13[%c0_118, %c0_119] : memref<2x128xf32, #tpu.memory_space<vmem>>, vector<2x128xf32>
    tpu.vector_store %arg13[%c0_118, %c0_119], %380 {strides = array<i32>} : memref<2x128xf32, #tpu.memory_space<vmem>>, vector<2x128xf32>,
    return
  }
  func.func @transform_0(%arg0: i32) -> (i32, i32, i32) {
    %c0_i32 = arith.constant 0 : i32
    %c0_i32_0 = arith.constant 0 : i32
    %c0_i32_1 = arith.constant 0 : i32
    return %arg0, %c0_i32, %c0_i32_0 : i32, i32, i32
  }
  func.func @transform_1(%arg0: i32) -> (i32, i32, i32) {
    %c0_i32 = arith.constant 0 : i32
    %c0_i32_0 = arith.constant 0 : i32
    %c0_i32_1 = arith.constant 0 : i32
    return %arg0, %c0_i32, %c0_i32_0 : i32, i32, i32
  }
  func.func @transform_2(%arg0: i32) -> (i32, i32) {
    %c0_i32 = arith.constant 0 : i32
    %c0_i32_0 = arith.constant 0 : i32
    %c0_i32_1 = arith.constant 0 : i32
    return %c0_i32, %c0_i32_0 : i32, i32
  }
  func.func @transform_3(%arg0: i32) -> (i32, i32) {
    %c0_i32 = arith.constant 0 : i32
    %c0_i32_0 = arith.constant 0 : i32
    %c0_i32_1 = arith.constant 0 : i32
    return %c0_i32, %c0_i32_0 : i32, i32
  }
  func.func @transform_4(%arg0: i32) -> (i32, i32) {
    %c0_i32 = arith.constant 0 : i32
    %c0_i32_0 = arith.constant 0 : i32
    %c0_i32_1 = arith.constant 0 : i32
    return %c0_i32, %c0_i32_0 : i32, i32
  }
  func.func @transform_5(%arg0: i32) -> (i32, i32) {
    %c0_i32 = arith.constant 0 : i32
    %c0_i32_0 = arith.constant 0 : i32
    %c0_i32_1 = arith.constant 0 : i32
    return %c0_i32, %c0_i32_0 : i32, i32
  }
  func.func @transform_6(%arg0: i32) -> (i32, i32) {
    %c0_i32 = arith.constant 0 : i32
    %c0_i32_0 = arith.constant 0 : i32
    %c0_i32_1 = arith.constant 0 : i32
    return %c0_i32, %c0_i32_0 : i32, i32
  }
  func.func @transform_7(%arg0: i32) -> (i32, i32) {
    %c0_i32 = arith.constant 0 : i32
    %c0_i32_0 = arith.constant 0 : i32
    %c0_i32_1 = arith.constant 0 : i32
    return %c0_i32, %c0_i32_0 : i32, i32
  }
  func.func @transform_8(%arg0: i32) -> (i32, i32) {
    %c0_i32 = arith.constant 0 : i32
    %c0_i32_0 = arith.constant 0 : i32
    %c0_i32_1 = arith.constant 0 : i32
    return %c0_i32, %c0_i32_0 : i32, i32
  }
  func.func @transform_9(%arg0: i32) -> (i32, i32) {
    %c0_i32 = arith.constant 0 : i32
    %c0_i32_0 = arith.constant 0 : i32
    %c0_i32_1 = arith.constant 0 : i32
    return %c0_i32, %c0_i32_0 : i32, i32
  }
  func.func @transform_10(%arg0: i32) -> (i32, i32) {
    %c0_i32 = arith.constant 0 : i32
    %c0_i32_0 = arith.constant 0 : i32
    %c0_i32_1 = arith.constant 0 : i32
    return %c0_i32, %c0_i32_0 : i32, i32
  }
  func.func @transform_11(%arg0: i32) -> (i32, i32) {
    %c0_i32 = arith.constant 0 : i32
    %c0_i32_0 = arith.constant 0 : i32
    %c0_i32_1 = arith.constant 0 : i32
    return %c0_i32, %c0_i32_0 : i32, i32
  }
  func.func @transform_12(%arg0: i32) -> (i32, i32) {
    %c0_i32 = arith.constant 0 : i32
    %c0_i32_0 = arith.constant 0 : i32
    return %arg0, %c0_i32 : i32, i32
  }
  func.func @transform_13(%arg0: i32) -> (i32, i32) {
    %c0_i32 = arith.constant 0 : i32
    %c0_i32_0 = arith.constant 0 : i32
    return %arg0, %c0_i32 : i32, i32
  }
}

</mosaic_0001>

<bundles_post_ra>
// kernel: tpu_custom_call.1
= control target key start
LH: loop header
LB: loop body
LE: loop exit
PB: predicated region body
PF: predicated region fallthrough
CT: control target
= control target key end

     0   :  { %19 = vsyncpa [#allocation3], 0  ;;  %s4547_s0 = inlined_call_operand.vmem [shape: f32[2,16,32], index: 0, kind: input, shape index: {}]   ;;  %s4548_s1 = inlined_call_operand.hbm [shape: f32[2,4,32], index: 1, kind: input, shape index: {}]   ;;  %s4549_s2 = inlined_call_operand.vmem [shape: f32[32,32], index: 2, kind: input, shape index: {}]   ;;  %s4550_s3 = inlined_call_operand.vmem [shape: f32[32,64], index: 3, kind: input, shape index: {}]   ;;  %s4551_s4 = inlined_call_operand.vmem [shape: f32[32,96], index: 4, kind: input, shape index: {}]   ;;  %s4552_s5 = inlined_call_operand.vmem [shape: f32[32,96], index: 5, kind: input, shape index: {}]   ;;  %s4553_s6 = inlined_call_operand.vmem [shape: f32[2,96], index: 6, kind: input, shape index: {}]   ;;  %s4554_s7 = inlined_call_operand.hbm [shape: f32[32,128], index: 7, kind: input, shape index: {}]   ;;  %s4555_s8 = inlined_call_operand.vmem [shape: f32[1,128], index: 8, kind: input, shape index: {}]   ;;  %s4556_s9 = inlined_call_operand.vmem [shape: f32[128,32], index: 9, kind: input, shape index: {}]   ;;  %s4557_s10 = inlined_call_operand.vmem [shape: f32[2,32], index: 10, kind: input, shape index: {}]   ;;  %s4558_s11 = inlined_call_operand.vmem [shape: f32[5,32], index: 11, kind: input, shape index: {}]   ;;  %s4559_s12 = inlined_call_operand.hbm [shape: f32[2,128], index: 12, kind: output, shape index: {0}]   ;;  %s4560_s13 = inlined_call_operand.hbm [shape: f32[2,64], index: 13, kind: output, shape index: {1}]  }
   0x1   :  { %20 = vsyncpa [#allocation6], 0 }
   0x2   :  { %21 = vsyncpa [#allocation4], 0 }
   0x3   :  { %22 = vsyncpa [#allocation9], 0  ;;  %s3641_s25 = smov [#allocation2]  }
   0x4   :  { %s30_s26 = sshll.u32 %s3641_s25, 4  ;;  %s31_s26 = int_to_ptr.vmem [resolvable:$true] %s30_s26 }
   0x5   :  { %s3561_s27 = scalar_lea.vmem %s31_s26, 128  ;;  %p3566_p1 = scmp.lt.s32.totalorder %s31_s26, %s31_s26 }
   0x6   :  { %p3562_p0 = scmp.ne.s32.totalorder %s31_s26, %s3561_s27  ;;  %p3567_p2 = scmp.lt.s32.totalorder %s3561_s27, %s3561_s27 }
   0x8   :  { %p3568_p3 = por %p3567_p2, %p3566_p1 }
   0xa   :  { %p3569_p4 = pnand %p3568_p3, %p3562_p0 }
   0xc   :  { %3572 = shalt.err (!%p3569_p4)
}
   0xd   :  { %s3642_s28 = smov 64   ;;  %s3643_s29 = smov 4  }
   0xe   :  { %36 = dma.hbm_to_vmem [thread:$0]  %s4548_s1, 128, %s31_s26, [#allocation3], %s3642_s28, %s3642_s28, %s3643_s29  }
   0xf   :  { %s3644_s15 = smov [#allocation5]  }
  0x10   :  { %s52_s16 = sshll.u32 %s3644_s15, 4  ;;  %s53_s16 = int_to_ptr.vmem [resolvable:$true] %s52_s16 }
  0x11   :  { %s3581_s17 = scalar_lea.vmem %s53_s16, 512  ;;  %p3586_p6 = scmp.lt.s32.totalorder %s53_s16, %s53_s16 }
  0x12   :  { %p3582_p5 = scmp.ne.s32.totalorder %s53_s16, %s3581_s17  ;;  %p3587_p7 = scmp.lt.s32.totalorder %s3581_s17, %s3581_s17 }
  0x14   :  { %p3588_p8 = por %p3587_p7, %p3586_p6 }
  0x16   :  { %p3589_p9 = pnand %p3588_p8, %p3582_p5 }
  0x18   :  { %3592 = shalt.err (!%p3589_p9)
}
  0x19   :  { %s3645_s18 = smov 128   ;;  %s3646_s19 = smov 8  }
  0x1a   :  { %58 = dma.hbm_to_vmem [thread:$0]  %s4554_s7, 512, %s53_s16, [#allocation6], %s3645_s18, %s3645_s18, %s3646_s19  }
  0x1b   :  { %3633 = dma.done.wait [#allocation3], 128  }
  0x1c   :  { %3634 = vsyncadd [#allocation3], 4294967168 }
  0x1d   :  { %3635 = dma.done.wait [#allocation6], 512  }
  0x1e   :  { %3636 = vsyncadd [#allocation6], 4294966784  ;;  %vm157_vm0 = vcmask 261120   ;;  %v153_v0 = vld [vmem:[%s4547_s0] sm:$0xff]  ;;  %v154_v5 = vld [vmem:[%s4547_s0 + $0x8] sm:$0xff]  ;;  %v338_v14 = vlaneseq  ;;  %v4563_v56 = vmov 0.0  }
  0x1f   :  { %v324_v1 = vld [vmem:[#allocation2] sm:$0xf]  ;;  %v325_v2 = vld [vmem:[#allocation2 + $0x4] sm:$0xf]  ;;  %v158_v3 = vsel %vm157_vm0, %v153_v0, 0.0  ;;  %v155_v6 = vld [vmem:[%s4547_s0 + $0x10] sm:$0xff]  ;;  %3141 = vmatprep.subr.mxu1 %v4563_v56 }
  0x20   :  { %v3739_v4 = vcombine.low %v324_v1, %v325_v2  ;;  %159 = vadd.xlane.f32.xlu0 %v158_v3  ;;  %v161_v8 = vsel %vm157_vm0, %v154_v5, 0.0  ;;  %v156_v9 = vld [vmem:[%s4547_s0 + $0x18] sm:$0xff]  ;;  %v164_v10 = vsel %vm157_vm0, %v155_v6, 0.0  ;;  %v3647_v12 = vmov 839922192   ;;  %v79_v53 = vld [vmem:[%s4550_s3 + $0x10] sm:$0xff] }
  0x21   :  { %v167_v11 = vsel %vm157_vm0, %v156_v9, 0.0  ;;  %v336_v13 = vunpack.c.l.s4 %v3647_v12  ;;  %v3648_v15 = vmov 1985246804   ;;  %v3755_v18 = vshrl.u32 %v338_v14, 7  ;;  %v80_v52 = vld [vmem:[%s4550_s3 + $0x18] sm:$0xff]  ;;  %v78_v54 = vld [vmem:[%s4550_s3 + $0x8] sm:$0xff] }
  0x22   :  { %v330_v7 = vsel %vm157_vm0, %v3739_v4, 0.0  ;;  %v343_v16 = vunpack.c.l.s4 %v3648_v15  ;;  %3109 = vmatprep.subr.mxu0 %v80_v52  ;;  %v77_v55 = vld [vmem:[%s4550_s3] sm:$0xff]  ;;  %vm3650_vm1 = vmmov 0   ;;  %s3651_s14 = smov 96   ;;  %vm629_vm2 = vcmask 125952   ;;  %s3652_s15 = smov 32  }
  0x23   :  { %331 = vadd.xlane.f32.xlu1 %v330_v7  ;;  %v337_v17 = vunpack.c.0.s8 %v336_v13  ;;  %4570 = vst [vmem:[#allocation14_spill] sm:$0xff] %v3755_v18  ;;  %3110 = vmatpush3.msra.mxu0 %v80_v52  ;;  %v2910_v12 = vld [vmem:[%s4557_s10 + $0x1] ss:$0 sm:$0xff]  ;;  %vm686_vm3 = vcmask 130048   ;;  %vm2285_vm4 = vcmask 1041409   ;;  %s3654_s18 = smov 48  }
  0x24   :  { %162 = vadd.xlane.f32.xlu0 %v161_v8  ;;  %v344_v19 = vunpack.c.0.s8 %v343_v16  ;;  %3111 = vmatprep.subr.mxu0 %v79_v53  ;;  %vm2307_vm5 = vcmask 392192   ;;  %s3655_s3 = smov [#allocation8]   ;;  %vm2309_vm6 = vcmask 517120  }
  0x25   :  { %v3758_v22 = vsub.s32 %v337_v17, %v3755_v18  ;;  %3112 = vmatpush3.msra.mxu0 %v79_v53  ;;  %3145 = vmatprep.mubr.msk.f32.mxu1 %vm3650_vm1, %v4563_v56  ;;  %s2887_s19 = sshll.u32 %s3655_s3, 4  ;;  %s2888_s19 = int_to_ptr.vmem [resolvable:$true] %s2887_s19 }
  0x26   :  { %v3761_v23 = vsub.s32 %v344_v19, %v3755_v18  ;;  %3113 = vmatprep.subr.mxu0 %v78_v54  ;;  %v3821_v19 = vld [vmem:[%s4558_s11] ss:$0 sm:$0xff]  ;;  %s3593_s20 = scalar_lea.vmem %s2888_s19, 32  ;;  %p3598_p11 = scmp.lt.s32.totalorder %s2888_s19, %s2888_s19 }
  0x27   :  { %165 = vadd.xlane.f32.xlu1 %v164_v10  ;;  %3114 = vmatpush3.msra.mxu0 %v78_v54  ;;  %v2909_v10 = vld [vmem:[%s4557_s10] ss:$0 sm:$0xff]  ;;  %p3594_p10 = scmp.ne.s32.totalorder %s2888_s19, %s3593_s20  ;;  %p3599_p12 = scmp.lt.s32.totalorder %s3593_s20, %s3593_s20 }
  0x28   :  { %168 = vadd.xlane.f32.xlu0 %v167_v11  ;;  %3115 = vmatprep.subr.mxu0 %v77_v55 }
  0x29   :  { %3116 = vmatpush3.msra.mxu0 %v77_v55  ;;  %p3600_p13 = por %p3599_p12, %p3598_p11 }
  0x2a   :  { %3123 = vmatprep.subr.mxu0 %v4563_v56 }
  0x2b   :  { %p3601_p0 = pnand %p3600_p13, %p3594_p10 }
  0xa9   :  { %v160_v20 = vpop.xlane.xlu0 %159 }
  0xaa   :  { %v171_v21 = vmul.f32 0.03125, %v160_v20 }
  0xac   :  { %v332_v24 = vpop.xlane.xlu1 %331  ;;  %v3763_v25 = vsub.f32 %v153_v0, %v171_v21 }
  0xad   :  { %v333_v26 = vmul.f32 0.03125, %v332_v24  ;;  %v163_v27 = vpop.xlane.xlu0 %162 }
  0xae   :  { %v172_v30 = vmul.f32 0.03125, %v163_v27  ;;  %v179_v31 = vmul.f32 %v3763_v25, %v3763_v25  ;;  %v3828_v27 = vld [vmem:[%s4549_s2 + $0x18] sm:$0xff] }
  0xaf   :  { %v341_v28 = vrot.slane %v333_v26, %v3758_v22  ;;  %v348_v29 = vrot.slane %v333_v26, %v3761_v23 }
  0xb0   :  { %v166_v32 = vpop.xlane.xlu1 %165  ;;  %v3773_v35 = vsub.f32 %v154_v5, %v172_v30  ;;  %v183_v37 = vsel %vm157_vm0, %v179_v31, 0.0  ;;  %v385_v31 = vcombine.high %v3821_v19, %v3821_v19 }
  0xb1   :  { %v3769_v33 = vsub.f32 %v324_v1, %v341_v28  ;;  %v3771_v34 = vsub.f32 %v325_v2, %v348_v29  ;;  %v173_v36 = vmul.f32 0.03125, %v166_v32  ;;  %v169_v38 = vpop.xlane.xlu0 %168  ;;  %184 = vadd.xlane.f32.xlu1 %v183_v37  ;;  %v3834_v29 = vld [vmem:[%s4558_s11 + $0x1] ss:$0 sm:$0xff] }
  0xb2   :  { %v174_v40 = vmul.f32 0.03125, %v169_v38  ;;  %v180_v41 = vmul.f32 %v3773_v35, %v3773_v35  ;;  %v3844_v38 = vld [vmem:[%s4549_s2 + $0x10] sm:$0xff] }
  0xb3   :  { %v3776_v39 = vsub.f32 %v155_v6, %v173_v36  ;;  %v353_v42 = vmul.f32 %v3769_v33, %v3769_v33  ;;  %v354_v43 = vmul.f32 %v3771_v34, %v3771_v34 }
  0xb4   :  { %v3784_v44 = vsub.f32 %v156_v9, %v174_v40  ;;  %v186_v45 = vsel %vm157_vm0, %v180_v41, 0.0  ;;  %v3856_v41 = vld [vmem:[%s4549_s2 + $0x8] sm:$0xff] }
  0xb5   :  { %v181_v46 = vmul.f32 %v3776_v39, %v3776_v39  ;;  %187 = vadd.xlane.f32.xlu0 %v186_v45  ;;  %v357_v49 = vcombine.low %v353_v42, %v354_v43 }
  0xb6   :  { %v182_v48 = vmul.f32 %v3784_v44, %v3784_v44 }
  0xb7   :  { %v189_v47 = vsel %vm157_vm0, %v181_v46, 0.0  ;;  %v359_v51 = vsel %vm157_vm0, %v357_v49, 0.0 }
  0xb8   :  { %190 = vadd.xlane.f32.xlu1 %v189_v47  ;;  %v192_v50 = vsel %vm157_vm0, %v182_v48, 0.0 }
  0xb9   :  { %193 = vadd.xlane.f32.xlu0 %v192_v50 }
  0xbc   :  { %360 = vadd.xlane.f32.xlu1 %v359_v51 }
 0x13a   :  { %v185_v57 = vpop.xlane.xlu1 %184 }
 0x13b   :  { %v195_v58 = vmul.f32 0.03125, %v185_v57 }
 0x13d   :  { %v199_v59 = vadd.f32 1e-05, %v195_v58 }
 0x13e   :  { %v188_v60 = vpop.xlane.xlu0 %187 }
 0x13f   :  { %v196_v61 = vmul.f32 0.03125, %v188_v60  ;;  %3461 = vrsqrt.f32 %v199_v59 }
 0x141   :  { %v191_v62 = vpop.xlane.xlu1 %190  ;;  %v200_v63 = vadd.f32 1e-05, %v196_v61 }
 0x142   :  { %v197_v0 = vmul.f32 0.03125, %v191_v62  ;;  %v194_v1 = vpop.xlane.xlu0 %193 }
 0x143   :  { %3463 = vrsqrt.f32 %v200_v63  ;;  %v198_v3 = vmul.f32 0.03125, %v194_v1 }
 0x144   :  { %v201_v2 = vadd.f32 1e-05, %v197_v0 }
 0x145   :  { %v361_v5 = vpop.xlane.xlu1 %360  ;;  %v202_v6 = vadd.f32 1e-05, %v198_v3 }
 0x146   :  { %3465 = vrsqrt.f32 %v201_v2  ;;  %v362_v7 = vmul.f32 0.03125, %v361_v5 }
 0x147   :  { %3467 = vrsqrt.f32 %v202_v6 }
 0x148   :  { %v363_v8 = vadd.f32 1e-05, %v362_v7 }
 0x14a   :  { %3469 = vrsqrt.f32 %v363_v8 }
 0x14c   :  { %v3462_v9 = vpop.eup %3461 }
 0x14d   :  { %v207_v11 = vmul.f32 %v3462_v9, %v3763_v25 }
 0x14f   :  { %v215_v14 = vmul.f32 %v2909_v10, %v207_v11 }
 0x150   :  { %v3464_v13 = vpop.eup %3463 }
 0x151   :  { %v208_v15 = vmul.f32 %v3464_v13, %v3773_v35  ;;  %v223_v17 = vadd.f32 %v2910_v12, %v215_v14 }
 0x153   :  { %v3466_v16 = vpop.eup %3465  ;;  %v216_v20 = vmul.f32 %v2909_v10, %v208_v15  ;;  %3117 = vmatprep.mubr.msk.f32.mxu0 %vm157_vm0, %v223_v17 }
 0x154   :  { %v209_v21 = vmul.f32 %v3466_v16, %v3776_v39  ;;  %v3468_v24 = vpop.eup %3467  ;;  %v390_v39 = vcombine.high %v3834_v29, %v3834_v29 }
 0x155   :  { %v224_v25 = vadd.f32 %v2910_v12, %v216_v20  ;;  %v210_v28 = vmul.f32 %v3468_v24, %v3784_v44 }
 0x156   :  { %v217_v26 = vmul.f32 %v2909_v10, %v209_v21 }
 0x157   :  { %v3470_v30 = vpop.eup %3469  ;;  %3118 = vmatmul.mubr.msk.f32.vlgmr.msra.gmra.mxu0 %vm157_vm0, %v224_v25  ;;  %v218_v37 = vmul.f32 %v2909_v10, %v210_v28 }
 0x158   :  { %v372_v32 = vrot.slane %v3470_v30, %v3758_v22  ;;  %v379_v35 = vrot.slane %v3470_v30, %v3761_v23  ;;  %v225_v36 = vadd.f32 %v2910_v12, %v217_v26  ;;  %3124 = vmatpush3.msra.mxu0 %v3828_v27 }
 0x159   :  { %3125 = vmatprep.subr.mxu0 %v4563_v56  ;;  %v226_v23 = vadd.f32 %v2910_v12, %v218_v37 }
 0x15a   :  { %v382_v40 = vmul.f32 %v372_v32, %v3769_v33  ;;  %v383_v22 = vmul.f32 %v379_v35, %v3771_v34  ;;  %3120 = vmatprep.mubr.msk.f32.mxu0 %vm157_vm0, %v225_v36  ;;  %3126 = vmatpush3.msra.mxu0 %v3844_v38  ;;  %v3865_v33 = vld [vmem:[%s4549_s2] sm:$0xff] }
 0x15b   :  { %3121 = vmatmul.mubr.msk.f32.gmra.mxu0 %vm157_vm0, %v226_v23  ;;  %3127 = vmatprep.subr.mxu0 %v4563_v56 }
 0x15c   :  { %v387_v42 = vmul.f32 %v3821_v19, %v382_v40  ;;  %v388_v43 = vmul.f32 %v385_v31, %v383_v22  ;;  %3128 = vmatpush3.msra.mxu0 %v3856_v41  ;;  %3131 = vmatprep.mubr.msk.f32.mxu0 %vm3650_vm1, %v4563_v56 }
 0x15d   :  { %3129 = vmatprep.subr.mxu0 %v4563_v56 }
 0x15e   :  { %v392_v34 = vadd.f32 %v3834_v29, %v387_v42  ;;  %v393_v44 = vadd.f32 %v390_v39, %v388_v43  ;;  %3130 = vmatpush3.msra.mxu0 %v3865_v33 }
 0x15f   :  { %3134 = vmatprep.subr.mxu0 %v4563_v56 }
 0x160   :  { %v396_v45 = vcombine.low %v392_v34, %v393_v44 }
 0x162   :  { %3132 = vmatmul.mubr.msk.f32.vlgmr.msra.gmra.mxu0 %vm157_vm0, %v396_v45 }
 0x163   :  { %3138 = vmatprep.mubr.msk.f32.mxu0 %vm3650_vm1, %v4563_v56 }
 0x217   :  { %v3877_v46 = vpop.f32.mrf.mxu0 }
 0x218   :  { %3135 = vmatpush3.xpose.msk.msra.mxu0 %vm157_vm0, %v3877_v46 }
 0x219   :  { %v3881_v47 = vpop.f32.mrf.mxu0  ;;  %3136 = vmatprep.subr.mxu0 %v4563_v56 }
 0x21a   :  { %4571 = vst [vmem:[#allocation15_spill] sm:$0xff] %v3881_v47  ;;  %680 = vrot.lane.b32.xlu1 %v3881_v47, %s3651_s14 }
 0x21b   :  { %v3886_v48 = vpop.f32.mrf.mxu0 }
 0x21c   :  { %4572 = vst [vmem:[#allocation16_spill] sm:$0xff] %v3886_v48  ;;  %3137 = vmatpush3.xpose.msk.msra.mxu0 %vm157_vm0, %v3881_v47  ;;  %3142 = vmatpush3.xpose.msk.msra.mxu1 %vm157_vm0, %v3886_v48 }
 0x21d   :  { %3143 = vmatprep.subr.mxu1 %v4563_v56  ;;  %3148 = vmatprep.subr.mxu0 %v4563_v56  ;;  %v3896_v49 = vpop.f32.mrf.mxu0 }
 0x21e   :  { %762 = vrot.lane.b32.xlu1 %v3886_v48, %s3651_s14  ;;  %4573 = vst [vmem:[#allocation17_spill] sm:$0xff] %v3896_v49 }
 0x220   :  { %3144 = vmatpush3.xpose.msk.msra.mxu1 %vm157_vm0, %v3896_v49 }
 0x221   :  { %3173 = vmatprep.subr.mxu1 %v4563_v56 }
 0x222   :  { %v465_v50 = vpop.f32.mrf.mxu0 }
 0x223   :  { %v470_v51 = vcombine.high %v465_v50, %v465_v50  ;;  %3139 = vmatmul.mubr.msk.f32.vlgmr.msra.gmra.mxu0 %vm157_vm0, %v465_v50  ;;  %v3920_v50 = vld [vmem:[%s4552_s5 + $0x18] sm:$0xff] }
 0x224   :  { %v3133_v52 = vpop.f32.mrf.mxu0  ;;  %3152 = vmatprep.mubr.msk.f32.mxu0 %vm3650_vm1, %v4563_v56 }
 0x225   :  { %3146 = vmatmul.mubr.msk.f32.vlgmr.msra.gmra.mxu1 %vm157_vm0, %v470_v51  ;;  %v3925_v51 = vld [vmem:[%s4552_s5 + $0x10] sm:$0xff]  ;;  %v3932_v52 = vld [vmem:[%s4552_s5 + $0x8] sm:$0xff] }
 0x226   :  { %3181 = vmatprep.mubr.msk.f32.mxu1 %vm3650_vm1, %v4563_v56  ;;  %3174 = vmatpush3.msra.mxu1 %v3920_v50 }
 0x227   :  { %3175 = vmatprep.subr.mxu1 %v4563_v56 }
 0x228   :  { %3176 = vmatpush3.msra.mxu1 %v3925_v51 }
 0x229   :  { %3177 = vmatprep.subr.mxu1 %v4563_v56 }
 0x22a   :  { %3178 = vmatpush3.msra.mxu1 %v3932_v52 }
 0x22b   :  { %3179 = vmatprep.subr.mxu1 %v4563_v56 }
 0x2e3   :  { %v545_v53 = vpop.f32.mrf.mxu0 }
 0x2e4   :  { %v627_v54 = vmul.f32 0.17677669, %v545_v53  ;;  %v3939_v53 = vld [vmem:[%s4552_s5] sm:$0xff] }
 0x2e5   :  { %v3140_v55 = vpop.f32.mrf.mxu0  ;;  %v623_v57 = vpop.f32.mrf.mxu1  ;;  %3180 = vmatpush3.msra.mxu1 %v3939_v53 }
 0x2e6   :  { %v630_v58 = vsel %vm629_vm2, %v627_v54, -inf  ;;  %v628_v59 = vmul.f32 0.17677669, %v623_v57  ;;  %3182 = vmatmul.mubr.msk.f32.vlgmr.msra.gmra.mxu1 %vm157_vm0, %v3739_v4  ;;  %3195 = vmatprep.subr.mxu1 %v4563_v56 }
 0x2e7   :  { %v631_v60 = vrot.slane %v630_v58, 4  ;;  %v3147_v61 = vpop.f32.mrf.mxu1  ;;  %3227 = vmatprep.mubr.msk.f32.mxu1 %vm3650_vm1, %v4563_v56 }
 0x2e8   :  { %v637_v62 = vsel %vm629_vm2, %v628_v59, -inf }
 0x2e9   :  { %v632_v63 = vmax.f32 %v630_v58, %v631_v60  ;;  %v638_v0 = vrot.slane %v637_v62, 4 }
 0x2eb   :  { %v633_v1 = vrot.slane %v632_v63, 2  ;;  %v639_v2 = vmax.f32 %v637_v62, %v638_v0 }
 0x2ed   :  { %v634_v3 = vmax.f32 %v632_v63, %v633_v1  ;;  %v640_v5 = vrot.slane %v639_v2, 2  ;;  %v3974_v1 = vld [vmem:[%s4551_s4 + $0x18] sm:$0xff] }
 0x2ef   :  { %v635_v6 = vrot.slane %v634_v3, 1  ;;  %v641_v7 = vmax.f32 %v639_v2, %v640_v5  ;;  %v3981_v2 = vld [vmem:[%s4551_s4 + $0x10] sm:$0xff]  ;;  %v3995_v5 = vld [vmem:[%s4551_s4] sm:$0xff] }
 0x2f1   :  { %v636_v8 = vmax.f32 %v634_v3, %v635_v6  ;;  %v642_v9 = vrot.slane %v641_v7, 1  ;;  %v3988_v3 = vld [vmem:[%s4551_s4 + $0x8] sm:$0xff]  ;;  %v4002_v6 = vld [vmem:[%s4553_s6 + $0x1] ss:$0 sm:$0xff] }
 0x2f3   :  { %v644_v10 = vsub.f32 %v627_v54, %v636_v8  ;;  %v643_v11 = vmax.f32 %v641_v7, %v642_v9  ;;  %v3949_v54 = vpop.permute.xlu1 %680 }
 0x2f4   :  { %4574 = vst [vmem:[#allocation18_spill] sm:$0xff] %v3949_v54 }
 0x2f5   :  { %v646_v12 = vmul.f32 1.442695, %v644_v10  ;;  %v645_v13 = vsub.f32 %v628_v59, %v643_v11 }
 0x2f7   :  { %3471 = vpow2.f32 %v646_v12  ;;  %v648_v14 = vmul.f32 1.442695, %v645_v13  ;;  %v3951_v55 = vpop.permute.xlu1 %762 }
 0x2f9   :  { %3473 = vpow2.f32 %v648_v14 }
 0x304   :  { %v3472_v15 = vpop.eup %3471 }
 0x305   :  { %v650_v16 = vsel %vm629_vm2, %v3472_v15, 0.0 }
 0x306   :  { %v3474_v17 = vpop.eup %3473  ;;  %v651_v20 = vrot.slane %v650_v16, 4 }
 0x307   :  { %v657_v21 = vsel %vm629_vm2, %v3474_v17, 0.0 }
 0x308   :  { %v652_v24 = vadd.f32 %v651_v20, %v650_v16  ;;  %v658_v25 = vrot.slane %v657_v21, 4 }
 0x30a   :  { %v653_v26 = vrot.slane %v652_v24, 2  ;;  %v659_v28 = vadd.f32 %v658_v25, %v657_v21 }
 0x30c   :  { %v660_v30 = vrot.slane %v659_v28, 2  ;;  %v654_v31 = vadd.f32 %v653_v26, %v652_v24 }
 0x30e   :  { %v655_v32 = vrot.slane %v654_v31, 1  ;;  %v661_v35 = vadd.f32 %v660_v30, %v659_v28 }
 0x310   :  { %v656_v36 = vadd.f32 %v655_v32, %v654_v31  ;;  %v662_v37 = vrot.slane %v661_v35, 1 }
 0x312   :  { %3475 = vrcp.f32 %v656_v36  ;;  %v663_v39 = vadd.f32 %v662_v37, %v661_v35 }
 0x314   :  { %3477 = vrcp.f32 %v663_v39 }
 0x31f   :  { %v3476_v40 = vpop.eup %3475 }
 0x320   :  { %v665_v22 = vmul.f32 %v3476_v40, %v3472_v15  ;;  %v4012_v15 = vld [vmem:[%s4553_s6] ss:$0 sm:$0xff] }
 0x321   :  { %v3478_v23 = vpop.eup %3477 }
 0x322   :  { %v668_v42 = vadd.f32 1e-08, %v665_v22  ;;  %v667_v43 = vmul.f32 %v3478_v23, %v3474_v17 }
 0x324   :  { %v670_v34 = vsel %vm629_vm2, %v668_v42, 0.0  ;;  %v669_v44 = vadd.f32 1e-08, %v667_v43 }
 0x325   :  { %671 = vadd.xlane.f32.xlu0 %v670_v34 }
 0x326   :  { %v673_v45 = vsel %vm629_vm2, %v669_v44, 0.0 }
 0x327   :  { %674 = vadd.xlane.f32.xlu1 %v673_v45 }
 0x338   :  { %760 = vrot.lane.b32.xlu1 %v3896_v49, %s3651_s14 }
 0x33b   :  { %682 = vrot.lane.b32.xlu0 %v3877_v46, %s3651_s14 }
 0x3a6   :  { %v982_v7 = vpop.f32.mrf.mxu1 }
 0x3a7   :  { %v983_v8 = vadd.f32 %v4002_v6, %v982_v7  ;;  %v4037_v7 = vld [vmem:[#allocation5 + $0x10] sm:$0xff] }
 0x3a8   :  { %v3183_v9 = vpop.f32.mrf.mxu1 }
 0x3a9   :  { %994 = vrot.lane.b32.xlu0 %v983_v8, %s3642_s28  ;;  %v4045_v9 = vld [vmem:[#allocation5] sm:$0xff] }
 0x3ae   :  { %v672_v57 = vpop.xlane.xlu0 %671 }
 0x3af   :  { %3479 = vrcp.f32 %v672_v57 }
 0x3b0   :  { %v675_v58 = vpop.xlane.xlu1 %674 }
 0x3b1   :  { %3481 = vrcp.f32 %v675_v58  ;;  %v2907_v58 = vld [vmem:[%s4558_s11 + $0x3] ss:$0 sm:$0xff] }
 0x3b2   :  { %v3953_v59 = vpop.permute.xlu0 %682 }
 0x3b3   :  { %4575 = vst [vmem:[#allocation19_spill] sm:$0xff] %v3953_v59  ;;  %3149 = vmatpush3.msra.mxu0 %v3953_v59 }
 0x3b4   :  { %3150 = vmatprep.subr.mxu0 %v4563_v56  ;;  %v3963_v63 = vpop.permute.xlu1 %760 }
 0x3b5   :  { %3151 = vmatpush3.msra.mxu0 %v3949_v54 }
 0x3b6   :  { %3155 = vmatprep.subr.mxu0 %v4563_v56 }
 0x3bc   :  { %v3480_v60 = vpop.eup %3479 }
 0x3bd   :  { %v677_v61 = vmul.f32 %v3480_v60, %v668_v42 }
 0x3be   :  { %v3482_v62 = vpop.eup %3481 }
 0x3bf   :  { %3153 = vmatmul.mubr.msk.f32.vlgmr.msra.gmra.mxu0 %vm686_vm3, %v677_v61  ;;  %v679_v0 = vmul.f32 %v3482_v62, %v669_v44  ;;  %v2906_v62 = vld [vmem:[%s4558_s11 + $0x2] ss:$0 sm:$0xff] }
 0x3c0   :  { %3156 = vmatpush3.msra.mxu0 %v3951_v55  ;;  %3159 = vmatprep.mubr.msk.f32.mxu0 %vm3650_vm1, %v4563_v56 }
 0x3c1   :  { %3157 = vmatprep.subr.mxu0 %v4563_v56 }
 0x3c2   :  { %3158 = vmatpush3.msra.mxu0 %v3963_v63 }
 0x3c3   :  { %3160 = vmatmul.mubr.msk.f32.vlgmr.msra.gmra.mxu0 %vm686_vm3, %v679_v0  ;;  %3162 = vmatprep.subr.mxu0 %v4563_v56  ;;  %v4035_v0 = vld [vmem:[#allocation5 + $0x18] sm:$0xff] }
 0x3c4   :  { %3170 = vmatprep.mubr.msk.f32.mxu0 %vm3650_vm1, %v4563_v56  ;;  %3163 = vmatpush3.msra.mxu0 %v3974_v1 }
 0x3c5   :  { %3164 = vmatprep.subr.mxu0 %v4563_v56 }
 0x3c6   :  { %3165 = vmatpush3.msra.mxu0 %v3981_v2 }
 0x3c7   :  { %3166 = vmatprep.subr.mxu0 %v4563_v56 }
 0x3c8   :  { %3167 = vmatpush3.msra.mxu0 %v3988_v3 }
 0x3c9   :  { %3168 = vmatprep.subr.mxu0 %v4563_v56 }
 0x3ca   :  { %3169 = vmatpush3.msra.mxu0 %v3995_v5 }
 0x3cb   :  { %3184 = vmatprep.subr.mxu0 %v4563_v56 }
 0x41b   :  { %v995_v28 = vpop.permute.xlu0 %994 }
 0x47f   :  { %v756_v10 = vpop.f32.mrf.mxu0 }
 0x481   :  { %v3154_v11 = vpop.f32.mrf.mxu0 }
 0x483   :  { %v835_v12 = vpop.f32.mrf.mxu0 }
 0x484   :  { %v841_v13 = vcombine.low %v756_v10, %v835_v12 }
 0x485   :  { %v3161_v14 = vpop.f32.mrf.mxu0 }
 0x486   :  { %3171 = vmatmul.mubr.msk.f32.vlgmr.msra.gmra.mxu0 %vm157_vm0, %v841_v13  ;;  %v4054_v13 = vld [vmem:[%s4556_s9 + $0x78] sm:$0xff]  ;;  %v4059_v14 = vld [vmem:[%s4556_s9 + $0x70] sm:$0xff] }
 0x487   :  { %3192 = vmatprep.mubr.msk.f32.mxu0 %vm3650_vm1, %v4563_v56  ;;  %3185 = vmatpush3.msra.mxu0 %v4035_v0 }
 0x488   :  { %3186 = vmatprep.subr.mxu0 %v4563_v56  ;;  %3196 = vmatpush3.msra.mxu1 %v4054_v13 }
 0x489   :  { %3187 = vmatpush3.msra.mxu0 %v4037_v7  ;;  %3197 = vmatprep.subr.mxu1 %v4563_v56 }
 0x48a   :  { %3188 = vmatprep.subr.mxu0 %v4563_v56  ;;  %3198 = vmatpush3.msra.mxu1 %v4059_v14 }
 0x48b   :  { %3199 = vmatprep.subr.mxu1 %v4563_v56 }
 0x546   :  { %v910_v16 = vpop.f32.mrf.mxu0 }
 0x547   :  { %v911_v17 = vadd.f32 %v4012_v15, %v910_v16  ;;  %v4066_v16 = vld [vmem:[%s4556_s9 + $0x68] sm:$0xff] }
 0x548   :  { %v3172_v20 = vpop.f32.mrf.mxu0  ;;  %3200 = vmatpush3.msra.mxu1 %v4066_v16 }
 0x549   :  { %v986_v21 = vadd.f32 %v983_v8, %v911_v17  ;;  %v4041_v8 = vld [vmem:[#allocation5 + $0x8] sm:$0xff]  ;;  %3201 = vmatprep.subr.mxu1 %v4563_v56 }
 0x54a   :  { %3189 = vmatpush3.msra.mxu0 %v4041_v8 }
 0x54b   :  { %v2926_v24 = vmul.f32 -1.442695, %v986_v21  ;;  %3190 = vmatprep.subr.mxu0 %v4563_v56 }
 0x54c   :  { %3191 = vmatpush3.msra.mxu0 %v4045_v9 }
 0x54d   :  { %3483 = vpow2.f32 %v2926_v24  ;;  %3230 = vmatprep.subr.mxu0 %v4563_v56  ;;  %v4082_v24 = vld [vmem:[%s4556_s9 + $0x58] sm:$0xff] }
 0x55a   :  { %v3484_v25 = vpop.eup %3483 }
 0x55b   :  { %v990_v26 = vadd.f32 1.0, %v3484_v25 }
 0x55d   :  { %3485 = vrcp.f32 %v990_v26 }
 0x56a   :  { %v3486_v30 = vpop.eup %3485 }
 0x56b   :  { %v997_v31 = vmul.f32 %v3486_v30, %v995_v28  ;;  %v1004_v39 = vsub.f32 1.0, %v3486_v30  ;;  %v4091_v28 = vld [vmem:[%s4556_s9 + $0x50] sm:$0xff] }
 0x56d   :  { %999 = vrot.lane.b32.xlu1 %v997_v31, %s3642_s28  ;;  %v4099_v31 = vld [vmem:[%s4556_s9 + $0x48] sm:$0xff] }
 0x571   :  { %1010 = vrot.lane.b32.xlu1 %v3739_v4, %s3652_s15 }
 0x5df   :  { %v1000_v32 = vpop.permute.xlu1 %999 }
 0x5e0   :  { %v1002_v35 = vadd.f32 %v1000_v32, %v911_v17  ;;  %v4073_v17 = vld [vmem:[%s4556_s9 + $0x60] sm:$0xff] }
 0x5e1   :  { %3202 = vmatpush3.msra.mxu1 %v4073_v17 }
 0x5e2   :  { %3487 = vtanh.f32 %v1002_v35  ;;  %3203 = vmatprep.subr.mxu1 %v4563_v56  ;;  %v4107_v35 = vld [vmem:[%s4556_s9 + $0x40] sm:$0xff] }
 0x5e3   :  { %v1011_v37 = vpop.permute.xlu1 %1010  ;;  %3204 = vmatpush3.msra.mxu1 %v4082_v24 }
 0x5e4   :  { %v1013_v22 = vmul.f32 %v3486_v30, %v1011_v37  ;;  %3205 = vmatprep.subr.mxu1 %v4563_v56  ;;  %v4122_v37 = vld [vmem:[%s4556_s9 + $0x30] sm:$0xff] }
 0x5e5   :  { %3206 = vmatpush3.msra.mxu1 %v4091_v28 }
 0x5e6   :  { %3207 = vmatprep.subr.mxu1 %v4563_v56 }
 0x5e7   :  { %3208 = vmatpush3.msra.mxu1 %v4099_v31 }
 0x5e8   :  { %3209 = vmatprep.subr.mxu1 %v4563_v56 }
 0x5e9   :  { %3210 = vmatpush3.msra.mxu1 %v4107_v35 }
 0x5ea   :  { %3211 = vmatprep.subr.mxu1 %v4563_v56 }
 0x5ef   :  { %v3488_v36 = vpop.eup %3487 }
 0x5f0   :  { %1006 = vrot.lane.b32.xlu0 %v3488_v36, %s3651_s14  ;;  %v4115_v36 = vld [vmem:[%s4556_s9 + $0x38] sm:$0xff] }
 0x5f1   :  { %3212 = vmatpush3.msra.mxu1 %v4115_v36 }
 0x5f2   :  { %3213 = vmatprep.subr.mxu1 %v4563_v56 }
 0x5f3   :  { %3214 = vmatpush3.msra.mxu1 %v4122_v37 }
 0x5f4   :  { %3215 = vmatprep.subr.mxu1 %v4563_v56 }
 0x662   :  { %v1007_v40 = vpop.permute.xlu0 %1006 }
 0x663   :  { %v1009_v23 = vmul.f32 %v1007_v40, %v1004_v39  ;;  %v4129_v39 = vld [vmem:[%s4556_s9 + $0x28] sm:$0xff]  ;;  %v4136_v40 = vld [vmem:[%s4556_s9 + $0x20] sm:$0xff] }
 0x664   :  { %3216 = vmatpush3.msra.mxu1 %v4129_v39 }
 0x665   :  { %v4019_v42 = vadd.f32 %v1013_v22, %v1009_v23  ;;  %3217 = vmatprep.subr.mxu1 %v4563_v56  ;;  %v4143_v22 = vld [vmem:[%s4556_s9 + $0x18] sm:$0xff]  ;;  %v4150_v23 = vld [vmem:[%s4556_s9 + $0x10] sm:$0xff] }
 0x666   :  { %3218 = vmatpush3.msra.mxu1 %v4136_v40 }
 0x667   :  { %1016 = vrot.lane.b32.xlu0 %v4019_v42, %s3651_s14  ;;  %3219 = vmatprep.subr.mxu1 %v4563_v56 }
 0x668   :  { %3220 = vmatpush3.msra.mxu1 %v4143_v22 }
 0x669   :  { %3221 = vmatprep.subr.mxu1 %v4563_v56 }
 0x66a   :  { %3222 = vmatpush3.msra.mxu1 %v4150_v23 }
 0x66b   :  { %3223 = vmatprep.subr.mxu1 %v4563_v56 }
 0x6d9   :  { %v1017_v43 = vpop.permute.xlu0 %1016 }
 0x6da   :  { %v1019_v34 = vsel %vm157_vm0, %v1017_v43, 0.0 }
 0x6db   :  { %1020 = vadd.xlane.f32.xlu1 %v1019_v34 }
 0x6ec   :  { %1042 = vrot.lane.b32.xlu1 %v2907_v58, %s3652_s15 }
 0x764   :  { %v1021_v4 = vpop.xlane.xlu1 %1020 }
 0x765   :  { %v1022_v44 = vmul.f32 0.03125, %v1021_v4 }
 0x767   :  { %v1023_v45 = vsub.f32 %v4019_v42, %v1022_v44 }
 0x768   :  { %v4085_v26 = vpop.permute.xlu1 %1042 }
 0x769   :  { %v1024_v57 = vmul.f32 %v1023_v45, %v1023_v45 }
 0x76b   :  { %1026 = vrot.lane.b32.xlu0 %v1024_v57, %s3651_s14 }
 0x7dd   :  { %v1027_v60 = vpop.permute.xlu0 %1026 }
 0x7de   :  { %v1029_v61 = vsel %vm157_vm0, %v1027_v60, 0.0 }
 0x7df   :  { %1030 = vadd.xlane.f32.xlu0 %v1029_v61 }
 0x7f5   :  { %1037 = vrot.lane.b32.xlu0 %v2906_v62, %s3652_s15 }
 0x868   :  { %v1031_v10 = vpop.xlane.xlu0 %1030 }
 0x869   :  { %v1032_v11 = vmul.f32 0.03125, %v1031_v10 }
 0x86b   :  { %v1033_v12 = vadd.f32 1e-05, %v1032_v11 }
 0x86c   :  { %v4076_v21 = vpop.permute.xlu0 %1037 }
 0x86d   :  { %3489 = vrsqrt.f32 %v1033_v12 }
 0x87a   :  { %v3490_v20 = vpop.eup %3489 }
 0x87b   :  { %v1035_v25 = vmul.f32 %v3490_v20, %v1023_v45  ;;  %v2908_v45 = vld [vmem:[%s4558_s11 + $0x4] ss:$0 sm:$0xff] }
 0x87c   :  { %1198 = vrot.lane.b32.xlu0 %v2908_v45, %s3652_s15 }
 0x87d   :  { %v1040_v30 = vmul.f32 %v4076_v21, %v1035_v25 }
 0x87f   :  { %v1045_v32 = vadd.f32 %v4085_v26, %v1040_v30 }
 0x881   :  { %1047 = vrot.lane.b32.xlu1 %v1045_v32, %s3651_s14 }
 0x8ee   :  { %v4198_v61 = vpop.permute.xlu0 %1198 }
 0x8f3   :  { %v1048_v43 = vpop.permute.xlu1 %1047 }
 0x8f4   :  { %3193 = vmatmul.mubr.msk.f32.vlgmr.msra.gmra.mxu0 %vm157_vm0, %v1048_v43 }
 0x8f5   :  { %3231 = vmatpush3.msra.mxu0 %v3828_v27  ;;  %3238 = vmatprep.mubr.msk.f32.mxu0 %vm3650_vm1, %v4563_v56  ;;  %v4170_v27 = vld [vmem:[%s4556_s9 + $0x8] sm:$0xff] }
 0x8f6   :  { %3232 = vmatprep.subr.mxu0 %v4563_v56  ;;  %3224 = vmatpush3.msra.mxu1 %v4170_v27 }
 0x8f7   :  { %3233 = vmatpush3.msra.mxu0 %v3844_v38  ;;  %3225 = vmatprep.subr.mxu1 %v4563_v56  ;;  %v4177_v38 = vld [vmem:[%s4556_s9] sm:$0xff] }
 0x8f8   :  { %3234 = vmatprep.subr.mxu0 %v4563_v56  ;;  %3226 = vmatpush3.msra.mxu1 %v4177_v38 }
 0x8f9   :  { %3235 = vmatpush3.msra.mxu0 %v3856_v41  ;;  %3262 = vmatprep.subr.mxu1 %v4563_v56  ;;  %v4184_v41 = vld [vmem:[%s4555_s8] ss:$0 sm:$0xff] }
 0x8fa   :  { %3236 = vmatprep.subr.mxu0 %v4563_v56 }
 0x8fb   :  { %3237 = vmatpush3.msra.mxu0 %v3865_v33 }
 0x8fc   :  { %3241 = vmatprep.subr.mxu0 %v4563_v56 }
 0x9b4   :  { %v1117_v33 = vpop.f32.mrf.mxu0 }
 0x9b5   :  { %v1118_v34 = vadd.f32 %v4184_v41, %v1117_v33 }
 0x9b6   :  { %v3194_v4 = vpop.f32.mrf.mxu0 }
 0x9b7   :  { %v1121_v44 = vmax.f32 %v1118_v34, 0.0 }
 0x9b9   :  { %3228 = vmatmul.mubr.f32.vlgmr.msra.gmra.mxu1 %v1121_v44 }
 0x9ba   :  { %3263 = vmatpush3.msra.mxu1 %v3951_v55  ;;  %3266 = vmatprep.mubr.msk.f32.mxu1 %vm3650_vm1, %v4563_v56 }
 0x9bb   :  { %3264 = vmatprep.subr.mxu1 %v4563_v56 }
 0x9bc   :  { %3265 = vmatpush3.msra.mxu1 %v3963_v63 }
 0x9bd   :  { %3280 = vmatprep.subr.mxu1 %v4563_v56 }
 0xa79   :  { %v1188_v57 = vpop.f32.mrf.mxu1 }
 0xa7a   :  { %1193 = vrot.lane.b32.xlu1 %v1188_v57, %s3652_s15 }
 0xa7b   :  { %v3229_v58 = vpop.f32.mrf.mxu1 }
 0xaec   :  { %v1194_v60 = vpop.permute.xlu1 %1193 }
 0xaed   :  { %v1196_v62 = vadd.f32 %v1194_v60, %v4019_v42 }
 0xaef   :  { %v4202_v10 = vadd.f32 %v4198_v61, %v1196_v62 }
 0xaf1   :  { %1203 = vrot.lane.b32.xlu1 %v4202_v10, %s3651_s14 }
 0xb63   :  { %v4206_v11 = vpop.permute.xlu1 %1203 }
 0xb64   :  { %v1206_v12 = vsel %vm157_vm0, %v4206_v11, 0.0 }
 0xb65   :  { %1207 = vadd.xlane.f32.xlu0 %v1206_v12 }
 0xb7b   :  { %1223 = vrot.lane.b32.xlu0 %v3821_v19, %s3652_s15 }
 0xbee   :  { %v1208_v20 = vpop.xlane.xlu0 %1207 }
 0xbef   :  { %v1209_v25 = vmul.f32 0.03125, %v1208_v20 }
 0xbf1   :  { %v1210_v30 = vsub.f32 %v4202_v10, %v1209_v25 }
 0xbf2   :  { %v4217_v19 = vpop.permute.xlu0 %1223 }
 0xbf3   :  { %v1211_v42 = vmul.f32 %v1210_v30, %v1210_v30 }
 0xbf5   :  { %1213 = vrot.lane.b32.xlu1 %v1211_v42, %s3651_s14 }
 0xc67   :  { %v1214_v32 = vpop.permute.xlu1 %1213 }
 0xc68   :  { %v1216_v43 = vsel %vm157_vm0, %v1214_v32, 0.0 }
 0xc69   :  { %1217 = vadd.xlane.f32.xlu1 %v1216_v43 }
 0xc7a   :  { %1227 = vrot.lane.b32.xlu1 %v3834_v29, %s3652_s15 }
 0xcf2   :  { %v1218_v33 = vpop.xlane.xlu1 %1217 }
 0xcf3   :  { %v1219_v34 = vmul.f32 0.03125, %v1218_v33 }
 0xcf5   :  { %v1220_v4 = vadd.f32 1e-05, %v1219_v34 }
 0xcf6   :  { %v4219_v57 = vpop.permute.xlu1 %1227 }
 0xcf7   :  { %3491 = vrsqrt.f32 %v1220_v4 }
 0xd04   :  { %v3492_v44 = vpop.eup %3491 }
 0xd05   :  { %v1222_v45 = vmul.f32 %v3492_v44, %v1210_v30 }
 0xd07   :  { %v1226_v58 = vmul.f32 %v4217_v19, %v1222_v45 }
 0xd09   :  { %v1230_v60 = vadd.f32 %v4219_v57, %v1226_v58 }
 0xd0b   :  { %1232 = vrot.lane.b32.xlu0 %v1230_v60, %s3651_s14 }
 0xd7d   :  { %v1233_v62 = vpop.permute.xlu0 %1232 }
 0xd7e   :  { %3239 = vmatmul.mubr.msk.f32.vlgmr.msra.gmra.mxu0 %vm157_vm0, %v1233_v62 }
 0xd7f   :  { %3242 = vmatpush3.xpose.msk.msra.mxu0 %vm157_vm0, %v3877_v46  ;;  %3245 = vmatprep.mubr.msk.f32.mxu0 %vm3650_vm1, %v4563_v56 }
 0xd80   :  { %3243 = vmatprep.subr.mxu0 %v4563_v56 }
 0xd83   :  { %3244 = vmatpush3.xpose.msk.msra.mxu0 %vm157_vm0, %v3881_v47 }
 0xd84   :  { %3248 = vmatprep.subr.mxu0 %v4563_v56 }
 0xe3e   :  { %v1302_v29 = vpop.f32.mrf.mxu0 }
 0xe3f   :  { %3246 = vmatmul.mubr.msk.f32.vlgmr.msra.gmra.mxu0 %vm157_vm0, %v1302_v29  ;;  %v1307_v20 = vcombine.high %v1302_v29, %v1302_v29 }
 0xe40   :  { %3249 = vmatpush3.xpose.msk.msra.mxu0 %vm157_vm0, %v3886_v48  ;;  %v3240_v12 = vpop.f32.mrf.mxu0  ;;  %3252 = vmatprep.mubr.msk.f32.mxu0 %vm3650_vm1, %v4563_v56 }
 0xe41   :  { %3250 = vmatprep.subr.mxu0 %v4563_v56 }
 0xe44   :  { %3251 = vmatpush3.xpose.msk.msra.mxu0 %vm157_vm0, %v3896_v49 }
 0xe45   :  { %3255 = vmatprep.subr.mxu0 %v4563_v56 }
 0xe47   :  { %3253 = vmatmul.mubr.msk.f32.vlgmr.msra.gmra.mxu0 %vm157_vm0, %v1307_v20 }
 0xe48   :  { %3256 = vmatpush3.msra.mxu0 %v3953_v59  ;;  %3259 = vmatprep.mubr.msk.f32.mxu0 %vm3650_vm1, %v4563_v56 }
 0xe49   :  { %3257 = vmatprep.subr.mxu0 %v4563_v56 }
 0xe4a   :  { %3258 = vmatpush3.msra.mxu0 %v3949_v54 }
 0xe4b   :  { %3269 = vmatprep.subr.mxu0 %v4563_v56 }
 0xeff   :  { %v1376_v25 = vpop.f32.mrf.mxu0 }
 0xf00   :  { %v1452_v30 = vmul.f32 0.17677669, %v1376_v25 }
 0xf01   :  { %v3247_v42 = vpop.f32.mrf.mxu0 }
 0xf02   :  { %v1454_v32 = vsel %vm629_vm2, %v1452_v30, -inf }
 0xf03   :  { %v1455_v43 = vrot.slane %v1454_v32, 4 }
 0xf05   :  { %v1456_v33 = vmax.f32 %v1454_v32, %v1455_v43 }
 0xf07   :  { %v1457_v34 = vrot.slane %v1456_v33, 2  ;;  %v1448_v4 = vpop.f32.mrf.mxu0 }
 0xf08   :  { %v1453_v44 = vmul.f32 0.17677669, %v1448_v4 }
 0xf09   :  { %v1458_v45 = vmax.f32 %v1456_v33, %v1457_v34  ;;  %v3254_v58 = vpop.f32.mrf.mxu0 }
 0xf0a   :  { %v1461_v60 = vsel %vm629_vm2, %v1453_v44, -inf }
 0xf0b   :  { %v1459_v62 = vrot.slane %v1458_v45, 1  ;;  %v1462_v29 = vrot.slane %v1461_v60, 4 }
 0xf0d   :  { %v1460_v12 = vmax.f32 %v1458_v45, %v1459_v62  ;;  %v1463_v20 = vmax.f32 %v1461_v60, %v1462_v29 }
 0xf0f   :  { %v1468_v18 = vsub.f32 %v1452_v30, %v1460_v12  ;;  %v1464_v56 = vrot.slane %v1463_v20, 2 }
 0xf11   :  { %v1470_v54 = vmul.f32 1.442695, %v1468_v18  ;;  %v1465_v25 = vmax.f32 %v1463_v20, %v1464_v56 }
 0xf13   :  { %3493 = vpow2.f32 %v1470_v54  ;;  %v1466_v42 = vrot.slane %v1465_v25, 1 }
 0xf15   :  { %v1467_v59 = vmax.f32 %v1465_v25, %v1466_v42 }
 0xf17   :  { %v1469_v49 = vsub.f32 %v1453_v44, %v1467_v59 }
 0xf19   :  { %v1472_v32 = vmul.f32 1.442695, %v1469_v49 }
 0xf1b   :  { %3495 = vpow2.f32 %v1472_v32 }
 0xf20   :  { %v3494_v43 = vpop.eup %3493 }
 0xf21   :  { %v1474_v33 = vsel %vm629_vm2, %v3494_v43, 0.0 }
 0xf22   :  { %v1475_v34 = vrot.slane %v1474_v33, 4 }
 0xf24   :  { %v1476_v4 = vadd.f32 %v1475_v34, %v1474_v33 }
 0xf26   :  { %v1477_v58 = vrot.slane %v1476_v4, 2 }
 0xf28   :  { %v3496_v48 = vpop.eup %3495  ;;  %v1478_v47 = vadd.f32 %v1477_v58, %v1476_v4 }
 0xf29   :  { %v1481_v45 = vsel %vm629_vm2, %v3496_v48, 0.0 }
 0xf2a   :  { %v1482_v30 = vrot.slane %v1481_v45, 4  ;;  %v1479_v60 = vrot.slane %v1478_v47, 1 }
 0xf2c   :  { %v1483_v18 = vadd.f32 %v1482_v30, %v1481_v45  ;;  %v1480_v56 = vadd.f32 %v1479_v60, %v1478_v47 }
 0xf2e   :  { %v1484_v54 = vrot.slane %v1483_v18, 2  ;;  %3497 = vrcp.f32 %v1480_v56 }
 0xf30   :  { %v1485_v62 = vadd.f32 %v1484_v54, %v1483_v18 }
 0xf32   :  { %v1486_v59 = vrot.slane %v1485_v62, 1 }
 0xf34   :  { %v1487_v49 = vadd.f32 %v1486_v59, %v1485_v62 }
 0xf36   :  { %3499 = vrcp.f32 %v1487_v49 }
 0xf3b   :  { %v3498_v44 = vpop.eup %3497 }
 0xf3c   :  { %v1489_v29 = vmul.f32 %v3498_v44, %v3494_v43  ;;  %v4576_v43 = vmov 0.0  }
 0xf3e   :  { %v1492_v12 = vadd.f32 1e-08, %v1489_v29 }
 0xf40   :  { %v1494_v20 = vsel %vm629_vm2, %v1492_v12, 0.0 }
 0xf41   :  { %1495 = vadd.xlane.f32.xlu0 %v1494_v20 }
 0xf43   :  { %v3500_v25 = vpop.eup %3499 }
 0xf44   :  { %v1491_v42 = vmul.f32 %v3500_v25, %v3496_v48 }
 0xf46   :  { %v1493_v32 = vadd.f32 1e-08, %v1491_v42 }
 0xf48   :  { %v1497_v33 = vsel %vm629_vm2, %v1493_v32, 0.0 }
 0xf49   :  { %1498 = vadd.xlane.f32.xlu1 %v1497_v33 }
 0xfca   :  { %v1496_v34 = vpop.xlane.xlu0 %1495 }
 0xfcb   :  { %3501 = vrcp.f32 %v1496_v34 }
 0xfd2   :  { %v1499_v47 = vpop.xlane.xlu1 %1498 }
 0xfd3   :  { %3503 = vrcp.f32 %v1499_v47 }
 0xfd8   :  { %v3502_v4 = vpop.eup %3501 }
 0xfd9   :  { %v1501_v58 = vmul.f32 %v3502_v4, %v1492_v12 }
 0xfdb   :  { %3260 = vmatmul.mubr.msk.f32.vlgmr.msra.gmra.mxu0 %vm686_vm3, %v1501_v58 }
 0xfdc   :  { %3270 = vmatpush3.msra.mxu0 %v3974_v1  ;;  %3277 = vmatprep.mubr.msk.f32.mxu0 %vm3650_vm1, %v4576_v43 }
 0xfdd   :  { %3271 = vmatprep.subr.mxu0 %v4576_v43 }
 0xfde   :  { %3272 = vmatpush3.msra.mxu0 %v3981_v2 }
 0xfdf   :  { %3273 = vmatprep.subr.mxu0 %v4576_v43 }
 0xfe0   :  { %v3504_v48 = vpop.eup %3503  ;;  %3274 = vmatpush3.msra.mxu0 %v3988_v3 }
 0xfe1   :  { %v1503_v45 = vmul.f32 %v3504_v48, %v1493_v32  ;;  %3275 = vmatprep.subr.mxu0 %v4576_v43 }
 0xfe2   :  { %3276 = vmatpush3.msra.mxu0 %v3995_v5 }
 0xfe3   :  { %3267 = vmatmul.mubr.msk.f32.vlgmr.msra.gmra.mxu1 %vm686_vm3, %v1503_v45  ;;  %3291 = vmatprep.subr.mxu0 %v4576_v43 }
 0xfe4   :  { %3281 = vmatpush3.msra.mxu1 %v3920_v50  ;;  %3288 = vmatprep.mubr.msk.f32.mxu1 %vm3650_vm1, %v4576_v43 }
 0xfe5   :  { %3282 = vmatprep.subr.mxu1 %v4576_v43 }
 0xfe6   :  { %3283 = vmatpush3.msra.mxu1 %v3925_v51 }
 0xfe7   :  { %3284 = vmatprep.subr.mxu1 %v4576_v43 }
 0xfe8   :  { %3285 = vmatpush3.msra.mxu1 %v3932_v52 }
 0xfe9   :  { %3286 = vmatprep.subr.mxu1 %v4576_v43 }
 0xfea   :  { %3287 = vmatpush3.msra.mxu1 %v3939_v53 }
 0xfeb   :  { %3289 = vmatmul.mubr.msk.f32.vlgmr.msra.gmra.mxu1 %vm157_vm0, %v4206_v11  ;;  %3302 = vmatprep.subr.mxu1 %v4576_v43 }
 0xfec   :  { %3303 = vmatpush3.msra.mxu1 %v4054_v13  ;;  %3334 = vmatprep.mubr.msk.f32.mxu1 %vm3650_vm1, %v4576_v43 }
 0xfed   :  { %3304 = vmatprep.subr.mxu1 %v4576_v43 }
 0xfee   :  { %3305 = vmatpush3.msra.mxu1 %v4059_v14 }
 0xfef   :  { %3306 = vmatprep.subr.mxu1 %v4576_v43 }
 0xff0   :  { %3307 = vmatpush3.msra.mxu1 %v4066_v16 }
 0xff1   :  { %3308 = vmatprep.subr.mxu1 %v4576_v43 }
 0xff2   :  { %3309 = vmatpush3.msra.mxu1 %v4073_v17 }
 0xff3   :  { %3310 = vmatprep.subr.mxu1 %v4576_v43 }
 0xff4   :  { %3311 = vmatpush3.msra.mxu1 %v4082_v24 }
 0xff5   :  { %3312 = vmatprep.subr.mxu1 %v4576_v43 }
 0xff6   :  { %3313 = vmatpush3.msra.mxu1 %v4091_v28 }
 0xff7   :  { %3314 = vmatprep.subr.mxu1 %v4576_v43 }
 0xff8   :  { %3315 = vmatpush3.msra.mxu1 %v4099_v31 }
 0xff9   :  { %3316 = vmatprep.subr.mxu1 %v4576_v43 }
 0xffa   :  { %3317 = vmatpush3.msra.mxu1 %v4107_v35 }
 0xffb   :  { %3318 = vmatprep.subr.mxu1 %v4576_v43 }
 0xffc   :  { %3319 = vmatpush3.msra.mxu1 %v4115_v36 }
 0xffd   :  { %3320 = vmatprep.subr.mxu1 %v4576_v43 }
 0xffe   :  { %3321 = vmatpush3.msra.mxu1 %v4122_v37 }
 0xfff   :  { %3322 = vmatprep.subr.mxu1 %v4576_v43 }
0x1000   :  { %3323 = vmatpush3.msra.mxu1 %v4129_v39 }
0x1001   :  { %3324 = vmatprep.subr.mxu1 %v4576_v43 }
0x1002   :  { %3325 = vmatpush3.msra.mxu1 %v4136_v40 }
0x1003   :  { %3326 = vmatprep.subr.mxu1 %v4576_v43 }
0x1004   :  { %3327 = vmatpush3.msra.mxu1 %v4143_v22 }
0x1005   :  { %3328 = vmatprep.subr.mxu1 %v4576_v43 }
0x1006   :  { %3329 = vmatpush3.msra.mxu1 %v4150_v23 }
0x1007   :  { %3330 = vmatprep.subr.mxu1 %v4576_v43 }
0x1008   :  { %3331 = vmatpush3.msra.mxu1 %v4170_v27 }
0x1009   :  { %3332 = vmatprep.subr.mxu1 %v4576_v43 }
0x100a   :  { %3333 = vmatpush3.msra.mxu1 %v4177_v38 }
0x100b   :  { %3369 = vmatprep.subr.mxu1 %v4576_v43 }
0x109b   :  { %v1573_v50 = vpop.f32.mrf.mxu0 }
0x109d   :  { %v3261_v51 = vpop.f32.mrf.mxu0 }
0x10a3   :  { %v1646_v52 = vpop.f32.mrf.mxu1 }
0x10a4   :  { %v1652_v53 = vcombine.low %v1573_v50, %v1646_v52 }
0x10a5   :  { %v3268_v1 = vpop.f32.mrf.mxu1 }
0x10a6   :  { %3278 = vmatmul.mubr.msk.f32.vlgmr.msra.gmra.mxu0 %vm157_vm0, %v1652_v53  ;;  %v3535_v1 = vld [vmem:[%s4549_s2 + $0x18] sm:$0xff] }
0x10a7   :  { %3292 = vmatpush3.msra.mxu0 %v4035_v0  ;;  %3299 = vmatprep.mubr.msk.f32.mxu0 %vm3650_vm1, %v4576_v43 }
0x10a8   :  { %3293 = vmatprep.subr.mxu0 %v4576_v43 }
0x10a9   :  { %3294 = vmatpush3.msra.mxu0 %v4037_v7 }
0x10aa   :  { %3295 = vmatprep.subr.mxu0 %v4576_v43 }
0x10ab   :  { %v1793_v2 = vpop.f32.mrf.mxu1  ;;  %3296 = vmatpush3.msra.mxu0 %v4041_v8 }
0x10ac   :  { %v1794_v3 = vadd.f32 %v4002_v6, %v1793_v2  ;;  %3297 = vmatprep.subr.mxu0 %v4576_v43  ;;  %v3536_v2 = vld [vmem:[%s4549_s2 + $0x10] sm:$0xff] }
0x10ad   :  { %v3290_v5 = vpop.f32.mrf.mxu1  ;;  %3298 = vmatpush3.msra.mxu0 %v4045_v9 }
0x10ae   :  { %1805 = vrot.lane.b32.xlu0 %v1794_v3, %s3642_s28  ;;  %3337 = vmatprep.subr.mxu0 %v4576_v43  ;;  %v3538_v5 = vld [vmem:[%s4549_s2] sm:$0xff] }
0x1120   :  { %v1806_v56 = vpop.permute.xlu0 %1805 }
0x1166   :  { %v1721_v0 = vpop.f32.mrf.mxu0 }
0x1167   :  { %v1722_v11 = vadd.f32 %v4012_v15, %v1721_v0 }
0x1168   :  { %v3279_v7 = vpop.f32.mrf.mxu0 }
0x1169   :  { %v1797_v30 = vadd.f32 %v1794_v3, %v1722_v11  ;;  %v3537_v3 = vld [vmem:[%s4549_s2 + $0x8] sm:$0xff] }
0x116b   :  { %v2939_v60 = vmul.f32 -1.442695, %v1797_v30 }
0x116d   :  { %3505 = vpow2.f32 %v2939_v60 }
0x117a   :  { %v3506_v18 = vpop.eup %3505 }
0x117b   :  { %v1801_v8 = vadd.f32 1.0, %v3506_v18 }
0x117d   :  { %3507 = vrcp.f32 %v1801_v8 }
0x118a   :  { %v3508_v6 = vpop.eup %3507 }
0x118b   :  { %v1808_v54 = vmul.f32 %v3508_v6, %v1806_v56  ;;  %v1815_v49 = vsub.f32 1.0, %v3508_v6  ;;  %v1821_v44 = vmul.f32 %v3508_v6, %v4202_v10 }
0x118d   :  { %1810 = vrot.lane.b32.xlu1 %v1808_v54, %s3642_s28 }
0x11ff   :  { %v1811_v9 = vpop.permute.xlu1 %1810 }
0x1200   :  { %v1813_v62 = vadd.f32 %v1811_v9, %v1722_v11 }
0x1202   :  { %3509 = vtanh.f32 %v1813_v62 }
0x120f   :  { %v3510_v59 = vpop.eup %3509 }
0x1210   :  { %1817 = vrot.lane.b32.xlu0 %v3510_v59, %s3651_s14 }
0x1282   :  { %v1818_v15 = vpop.permute.xlu0 %1817 }
0x1283   :  { %v1820_v29 = vmul.f32 %v1818_v15, %v1815_v49 }
0x1285   :  { %v1822_v12 = vadd.f32 %v1821_v44, %v1820_v29 }
0x1287   :  { %1824 = vrot.lane.b32.xlu1 %v1822_v12, %s3651_s14 }
0x12f9   :  { %v1825_v20 = vpop.permute.xlu1 %1824 }
0x12fa   :  { %v1827_v25 = vsel %vm157_vm0, %v1825_v20, 0.0 }
0x12fb   :  { %1828 = vadd.xlane.f32.xlu0 %v1827_v25 }
0x1384   :  { %v1829_v42 = vpop.xlane.xlu0 %1828 }
0x1385   :  { %v1830_v32 = vmul.f32 0.03125, %v1829_v42 }
0x1387   :  { %v1831_v33 = vsub.f32 %v1822_v12, %v1830_v32 }
0x1389   :  { %v1832_v34 = vmul.f32 %v1831_v33, %v1831_v33 }
0x138b   :  { %1834 = vrot.lane.b32.xlu1 %v1832_v34, %s3651_s14  ;;  %v4577_v34 = vld [vmem:[#allocation15_spill] sm:$0xff] }
0x13fd   :  { %v1835_v47 = vpop.permute.xlu1 %1834 }
0x13fe   :  { %v1837_v4 = vsel %vm157_vm0, %v1835_v47, 0.0 }
0x13ff   :  { %1838 = vadd.xlane.f32.xlu1 %v1837_v4 }
0x1488   :  { %v1839_v58 = vpop.xlane.xlu1 %1838 }
0x1489   :  { %v1840_v10 = vmul.f32 0.03125, %v1839_v58  ;;  %v4580_v58 = vld [vmem:[#allocation19_spill] sm:$0xff] }
0x148b   :  { %v1841_v48 = vadd.f32 1e-05, %v1840_v10  ;;  %v4581_v10 = vld [vmem:[#allocation18_spill] sm:$0xff] }
0x148d   :  { %3511 = vrsqrt.f32 %v1841_v48 }
0x149a   :  { %v3512_v45 = vpop.eup %3511 }
0x149b   :  { %v1843_v50 = vmul.f32 %v3512_v45, %v1831_v33 }
0x149d   :  { %v1844_v51 = vmul.f32 %v1843_v50, %v4076_v21 }
0x149f   :  { %v1845_v52 = vadd.f32 %v1844_v51, %v4085_v26 }
0x14a1   :  { %1847 = vrot.lane.b32.xlu0 %v1845_v52, %s3651_s14 }
0x1513   :  { %v1848_v53 = vpop.permute.xlu0 %1847 }
0x1514   :  { %3300 = vmatmul.mubr.msk.f32.vlgmr.msra.gmra.mxu0 %vm157_vm0, %v1848_v53 }
0x1515   :  { %3338 = vmatpush3.msra.mxu0 %v3535_v1  ;;  %3345 = vmatprep.mubr.msk.f32.mxu0 %vm3650_vm1, %v4576_v43 }
0x1516   :  { %3339 = vmatprep.subr.mxu0 %v4576_v43 }
0x1517   :  { %3340 = vmatpush3.msra.mxu0 %v3536_v2 }
0x1518   :  { %3341 = vmatprep.subr.mxu0 %v4576_v43 }
0x1519   :  { %3342 = vmatpush3.msra.mxu0 %v3537_v3 }
0x151a   :  { %3343 = vmatprep.subr.mxu0 %v4576_v43 }
0x151b   :  { %3344 = vmatpush3.msra.mxu0 %v3538_v5 }
0x151c   :  { %3348 = vmatprep.subr.mxu0 %v4576_v43 }
0x15d4   :  { %v1917_v0 = vpop.f32.mrf.mxu0 }
0x15d5   :  { %v1918_v11 = vadd.f32 %v4184_v41, %v1917_v0 }
0x15d6   :  { %v3301_v7 = vpop.f32.mrf.mxu0 }
0x15d7   :  { %v1921_v30 = vmax.f32 %v1918_v11, 0.0 }
0x15d9   :  { %3335 = vmatmul.mubr.f32.vlgmr.msra.gmra.mxu1 %v1921_v30 }
0x15da   :  { %3370 = vmatpush3.msra.mxu1 %v3951_v55  ;;  %3373 = vmatprep.mubr.msk.f32.mxu1 %vm3650_vm1, %v4576_v43 }
0x15db   :  { %3371 = vmatprep.subr.mxu1 %v4576_v43 }
0x15dc   :  { %3372 = vmatpush3.msra.mxu1 %v3963_v63 }
0x15dd   :  { %3387 = vmatprep.subr.mxu1 %v4576_v43 }
0x1699   :  { %v1988_v60 = vpop.f32.mrf.mxu1 }
0x169a   :  { %1993 = vrot.lane.b32.xlu1 %v1988_v60, %s3652_s15 }
0x169b   :  { %v3336_v18 = vpop.f32.mrf.mxu1 }
0x170c   :  { %v1994_v8 = vpop.permute.xlu1 %1993 }
0x170d   :  { %v1996_v6 = vadd.f32 %v1994_v8, %v1822_v12 }
0x170f   :  { %v4365_v56 = vadd.f32 %v1996_v6, %v4198_v61 }
0x1711   :  { %1999 = vrot.lane.b32.xlu0 %v4365_v56, %s3651_s14 }
0x1783   :  { %v4369_v55 = vpop.permute.xlu0 %1999 }
0x1784   :  { %v2002_v54 = vsel %vm157_vm0, %v4369_v55, 0.0 }
0x1785   :  { %2003 = vadd.xlane.f32.xlu0 %v2002_v54 }
0x180e   :  { %v2004_v63 = vpop.xlane.xlu0 %2003 }
0x180f   :  { %v2005_v9 = vmul.f32 0.03125, %v2004_v63 }
0x1811   :  { %v2006_v62 = vsub.f32 %v4365_v56, %v2005_v9 }
0x1813   :  { %v2007_v59 = vmul.f32 %v2006_v62, %v2006_v62 }
0x1815   :  { %2009 = vrot.lane.b32.xlu1 %v2007_v59, %s3651_s14 }
0x1887   :  { %v2010_v49 = vpop.permute.xlu1 %2009 }
0x1888   :  { %v2012_v15 = vsel %vm157_vm0, %v2010_v49, 0.0 }
0x1889   :  { %2013 = vadd.xlane.f32.xlu1 %v2012_v15 }
0x1912   :  { %v2014_v44 = vpop.xlane.xlu1 %2013 }
0x1913   :  { %v2015_v29 = vmul.f32 0.03125, %v2014_v44 }
0x1915   :  { %v2016_v12 = vadd.f32 1e-05, %v2015_v29 }
0x1917   :  { %3513 = vrsqrt.f32 %v2016_v12 }
0x1924   :  { %v3514_v20 = vpop.eup %3513 }
0x1925   :  { %v2018_v25 = vmul.f32 %v3514_v20, %v2006_v62 }
0x1927   :  { %v2019_v42 = vmul.f32 %v2018_v25, %v4217_v19 }
0x1929   :  { %v2020_v32 = vadd.f32 %v2019_v42, %v4219_v57  ;;  %v4578_v57 = vld [vmem:[#allocation16_spill] sm:$0xff] }
0x192b   :  { %2022 = vrot.lane.b32.xlu0 %v2020_v32, %s3651_s14 }
0x199d   :  { %v2023_v33 = vpop.permute.xlu0 %2022 }
0x199e   :  { %3346 = vmatmul.mubr.msk.f32.vlgmr.msra.gmra.mxu0 %vm157_vm0, %v2023_v33 }
0x199f   :  { %3349 = vmatpush3.xpose.msk.msra.mxu0 %vm157_vm0, %v3877_v46  ;;  %3352 = vmatprep.mubr.msk.f32.mxu0 %vm3650_vm1, %v4576_v43  ;;  %v4579_v46 = vld [vmem:[#allocation17_spill] sm:$0xff] }
0x19a0   :  { %3350 = vmatprep.subr.mxu0 %v4576_v43 }
0x19a3   :  { %3351 = vmatpush3.xpose.msk.msra.mxu0 %vm157_vm0, %v4577_v34 }
0x19a4   :  { %3355 = vmatprep.subr.mxu0 %v4576_v43 }
0x1a5e   :  { %v2092_v19 = vpop.f32.mrf.mxu0 }
0x1a5f   :  { %3353 = vmatmul.mubr.msk.f32.vlgmr.msra.gmra.mxu0 %vm157_vm0, %v2092_v19  ;;  %v2097_v4 = vcombine.high %v2092_v19, %v2092_v19 }
0x1a60   :  { %3356 = vmatpush3.xpose.msk.msra.mxu0 %vm157_vm0, %v4578_v57  ;;  %v3347_v47 = vpop.f32.mrf.mxu0  ;;  %3359 = vmatprep.mubr.msk.f32.mxu0 %vm3650_vm1, %v4576_v43 }
0x1a61   :  { %3357 = vmatprep.subr.mxu0 %v4576_v43 }
0x1a64   :  { %3358 = vmatpush3.xpose.msk.msra.mxu0 %vm157_vm0, %v4579_v46 }
0x1a65   :  { %3362 = vmatprep.subr.mxu0 %v4576_v43 }
0x1a67   :  { %3360 = vmatmul.mubr.msk.f32.vlgmr.msra.gmra.mxu0 %vm157_vm0, %v2097_v4 }
0x1a68   :  { %3363 = vmatpush3.msra.mxu0 %v4580_v58  ;;  %3366 = vmatprep.mubr.msk.f32.mxu0 %vm3650_vm1, %v4576_v43 }
0x1a69   :  { %3364 = vmatprep.subr.mxu0 %v4576_v43 }
0x1a6a   :  { %3365 = vmatpush3.msra.mxu0 %v4581_v10 }
0x1a6b   :  { %3376 = vmatprep.subr.mxu0 %v4576_v43 }
0x1b1f   :  { %v2166_v48 = vpop.f32.mrf.mxu0 }
0x1b20   :  { %v2242_v45 = vmul.f32 0.17677669, %v2166_v48 }
0x1b21   :  { %v3354_v50 = vpop.f32.mrf.mxu0 }
0x1b22   :  { %v2244_v51 = vsel %vm629_vm2, %v2242_v45, -inf }
0x1b23   :  { %v2245_v52 = vrot.slane %v2244_v51, 4 }
0x1b25   :  { %v2246_v53 = vmax.f32 %v2244_v51, %v2245_v52 }
0x1b27   :  { %v2247_v1 = vrot.slane %v2246_v53, 2  ;;  %v2238_v2 = vpop.f32.mrf.mxu0 }
0x1b28   :  { %v2243_v3 = vmul.f32 0.17677669, %v2238_v2 }
0x1b29   :  { %v2248_v5 = vmax.f32 %v2246_v53, %v2247_v1  ;;  %v3361_v0 = vpop.f32.mrf.mxu0 }
0x1b2a   :  { %v2251_v11 = vsel %vm629_vm2, %v2243_v3, -inf }
0x1b2b   :  { %v2249_v7 = vrot.slane %v2248_v5, 1  ;;  %v2252_v30 = vrot.slane %v2251_v11, 4 }
0x1b2d   :  { %v2250_v60 = vmax.f32 %v2248_v5, %v2249_v7  ;;  %v2253_v18 = vmax.f32 %v2251_v11, %v2252_v30 }
0x1b2f   :  { %v2258_v8 = vsub.f32 %v2242_v45, %v2250_v60  ;;  %v2254_v6 = vrot.slane %v2253_v18, 2 }
0x1b31   :  { %v2260_v54 = vmul.f32 1.442695, %v2258_v8  ;;  %v2255_v63 = vmax.f32 %v2253_v18, %v2254_v6 }
0x1b33   :  { %3515 = vpow2.f32 %v2260_v54  ;;  %v2256_v9 = vrot.slane %v2255_v63, 1 }
0x1b35   :  { %v2257_v62 = vmax.f32 %v2255_v63, %v2256_v9 }
0x1b37   :  { %v2259_v59 = vsub.f32 %v2243_v3, %v2257_v62  ;;  %v3539_v62 = vld [vmem:[%s4551_s4 + $0x18] sm:$0xff] }
0x1b39   :  { %v2262_v49 = vmul.f32 1.442695, %v2259_v59  ;;  %v3540_v59 = vld [vmem:[%s4551_s4 + $0x10] sm:$0xff] }
0x1b3b   :  { %3517 = vpow2.f32 %v2262_v49 }
0x1b40   :  { %v3516_v15 = vpop.eup %3515 }
0x1b41   :  { %v2264_v44 = vsel %vm629_vm2, %v3516_v15, 0.0 }
0x1b42   :  { %v2265_v29 = vrot.slane %v2264_v44, 4 }
0x1b44   :  { %v2266_v12 = vadd.f32 %v2265_v29, %v2264_v44  ;;  %v3542_v29 = vld [vmem:[%s4551_s4] sm:$0xff] }
0x1b46   :  { %v2267_v20 = vrot.slane %v2266_v12, 2 }
0x1b48   :  { %v3518_v25 = vpop.eup %3517  ;;  %v2268_v42 = vadd.f32 %v2267_v20, %v2266_v12  ;;  %v3543_v12 = vld [vmem:[%s4552_s5 + $0x18] sm:$0xff]  ;;  %v3544_v20 = vld [vmem:[%s4552_s5 + $0x10] sm:$0xff] }
0x1b49   :  { %v2271_v32 = vsel %vm629_vm2, %v3518_v25, 0.0 }
0x1b4a   :  { %v2269_v33 = vrot.slane %v2268_v42, 1  ;;  %v2272_v34 = vrot.slane %v2271_v32, 4 }
0x1b4c   :  { %v2270_v19 = vadd.f32 %v2269_v33, %v2268_v42  ;;  %v2273_v57 = vadd.f32 %v2272_v34, %v2271_v32  ;;  %v3546_v42 = vld [vmem:[%s4552_s5] sm:$0xff] }
0x1b4e   :  { %3519 = vrcp.f32 %v2270_v19  ;;  %v2274_v47 = vrot.slane %v2273_v57, 2 }
0x1b50   :  { %v2275_v46 = vadd.f32 %v2274_v47, %v2273_v57 }
0x1b52   :  { %v2276_v4 = vrot.slane %v2275_v46, 1 }
0x1b54   :  { %v2277_v58 = vadd.f32 %v2276_v4, %v2275_v46 }
0x1b56   :  { %3521 = vrcp.f32 %v2277_v58 }
0x1b5b   :  { %v3520_v10 = vpop.eup %3519 }
0x1b5c   :  { %v2279_v48 = vmul.f32 %v3520_v10, %v3516_v15  ;;  %v3541_v15 = vld [vmem:[%s4551_s4 + $0x8] sm:$0xff] }
0x1b5e   :  { %v2311_v45 = vadd.f32 1e-08, %v2279_v48  ;;  %v2288_v53 = vrot.slane %v2279_v48, 1  ;;  %v2293_v1 = vrot.slane %v2279_v48, 2  ;;  %v2299_v11 = vrot.slane %v2279_v48, 3 }
0x1b60   :  { %v2313_v50 = vsel %vm629_vm2, %v2311_v45, 0.0 }
0x1b61   :  { %2314 = vadd.xlane.f32.xlu1 %v2313_v50 }
0x1b63   :  { %v3522_v51 = vpop.eup %3521 }
0x1b64   :  { %v2281_v52 = vmul.f32 %v3522_v51, %v3518_v25  ;;  %v3545_v25 = vld [vmem:[%s4552_s5 + $0x8] sm:$0xff] }
0x1b66   :  { %v2312_v2 = vadd.f32 1e-08, %v2281_v52  ;;  %v4410_v3 = vsel %vm2285_vm4, %v2281_v52, %v2288_v53  ;;  %v2284_v5 = vrot.slane %v2281_v52, 7  ;;  %v2294_v0 = vrot.slane %v2281_v52, 1 }
0x1b67   :  { %v2300_v7 = vrot.slane %v2281_v52, 2 }
0x1b68   :  { %v2316_v30 = vsel %vm629_vm2, %v2312_v2, 0.0  ;;  %v4414_v60 = vsel %vm2285_vm4, %v2284_v5, %v2279_v48  ;;  %v4417_v18 = vsel %vm2285_vm4, %v2294_v0, %v2293_v1 }
0x1b69   :  { %2317 = vadd.xlane.f32.xlu1 %v2316_v30  ;;  %v4420_v8 = vsel %vm2285_vm4, %v2300_v7, %v2299_v11 }
0x1bea   :  { %v2315_v6 = vpop.xlane.xlu1 %2314 }
0x1beb   :  { %3523 = vrcp.f32 %v2315_v6 }
0x1bf2   :  { %v2318_v54 = vpop.xlane.xlu1 %2317 }
0x1bf3   :  { %3525 = vrcp.f32 %v2318_v54 }
0x1bf8   :  { %v3524_v63 = vpop.eup %3523 }
0x1bf9   :  { %v2320_v9 = vmul.f32 %v3524_v63, %v2311_v45 }
0x1bfb   :  { %3367 = vmatmul.mubr.msk.f32.vlgmr.msra.gmra.mxu0 %vm686_vm3, %v2320_v9 }
0x1bfc   :  { %3377 = vmatpush3.msra.mxu0 %v3539_v62  ;;  %3384 = vmatprep.mubr.msk.f32.mxu0 %vm3650_vm1, %v4576_v43 }
0x1bfd   :  { %3378 = vmatprep.subr.mxu0 %v4576_v43 }
0x1bfe   :  { %3379 = vmatpush3.msra.mxu0 %v3540_v59 }
0x1bff   :  { %3380 = vmatprep.subr.mxu0 %v4576_v43 }
0x1c00   :  { %v3526_v49 = vpop.eup %3525  ;;  %3381 = vmatpush3.msra.mxu0 %v3541_v15 }
0x1c01   :  { %v2322_v44 = vmul.f32 %v3526_v49, %v2312_v2  ;;  %3382 = vmatprep.subr.mxu0 %v4576_v43 }
0x1c02   :  { %3383 = vmatpush3.msra.mxu0 %v3542_v29 }
0x1c03   :  { %3374 = vmatmul.mubr.msk.f32.vlgmr.msra.gmra.mxu1 %vm686_vm3, %v2322_v44  ;;  %3398 = vmatprep.subr.mxu0 %v4576_v43 }
0x1c04   :  { %3388 = vmatpush3.msra.mxu1 %v3543_v12  ;;  %3395 = vmatprep.mubr.msk.f32.mxu1 %vm3650_vm1, %v4576_v43 }
0x1c05   :  { %3389 = vmatprep.subr.mxu1 %v4576_v43 }
0x1c06   :  { %3390 = vmatpush3.msra.mxu1 %v3544_v20 }
0x1c07   :  { %3391 = vmatprep.subr.mxu1 %v4576_v43 }
0x1c08   :  { %3392 = vmatpush3.msra.mxu1 %v3545_v25 }
0x1c09   :  { %3393 = vmatprep.subr.mxu1 %v4576_v43 }
0x1c0a   :  { %3394 = vmatpush3.msra.mxu1 %v3546_v42  ;;  %v4582_v42 = vld [vmem:[#allocation14_spill] sm:$0xff] }
0x1c0b   :  { %3396 = vmatmul.mubr.msk.f32.vlgmr.msra.gmra.mxu1 %vm157_vm0, %v4369_v55  ;;  %3409 = vmatprep.subr.mxu1 %v4576_v43 }
0x1c0c   :  { %3410 = vmatpush3.msra.mxu1 %v4054_v13  ;;  %3441 = vmatprep.mubr.msk.f32.mxu1 %vm3650_vm1, %v4576_v43 }
0x1c0d   :  { %3411 = vmatprep.subr.mxu1 %v4576_v43 }
0x1c0e   :  { %3412 = vmatpush3.msra.mxu1 %v4059_v14 }
0x1c0f   :  { %3413 = vmatprep.subr.mxu1 %v4576_v43 }
0x1c10   :  { %3414 = vmatpush3.msra.mxu1 %v4066_v16 }
0x1c11   :  { %3415 = vmatprep.subr.mxu1 %v4576_v43 }
0x1c12   :  { %3416 = vmatpush3.msra.mxu1 %v4073_v17 }
0x1c13   :  { %3417 = vmatprep.subr.mxu1 %v4576_v43 }
0x1c14   :  { %3418 = vmatpush3.msra.mxu1 %v4082_v24 }
0x1c15   :  { %3419 = vmatprep.subr.mxu1 %v4576_v43 }
0x1c16   :  { %3420 = vmatpush3.msra.mxu1 %v4091_v28  ;;  %v3547_v28 = vld [vmem:[#allocation5 + $0x18] sm:$0xff] }
0x1c17   :  { %3421 = vmatprep.subr.mxu1 %v4576_v43 }
0x1c18   :  { %3422 = vmatpush3.msra.mxu1 %v4099_v31  ;;  %v3548_v31 = vld [vmem:[#allocation5 + $0x10] sm:$0xff] }
0x1c19   :  { %3423 = vmatprep.subr.mxu1 %v4576_v43 }
0x1c1a   :  { %3424 = vmatpush3.msra.mxu1 %v4107_v35 }
0x1c1b   :  { %3425 = vmatprep.subr.mxu1 %v4576_v43 }
0x1c1c   :  { %3426 = vmatpush3.msra.mxu1 %v4115_v36  ;;  %v3549_v36 = vld [vmem:[#allocation5 + $0x8] sm:$0xff] }
0x1c1d   :  { %3427 = vmatprep.subr.mxu1 %v4576_v43 }
0x1c1e   :  { %3428 = vmatpush3.msra.mxu1 %v4122_v37  ;;  %v3550_v37 = vld [vmem:[%s4553_s6 + $0x1] ss:$0 sm:$0xff] }
0x1c1f   :  { %3429 = vmatprep.subr.mxu1 %v4576_v43 }
0x1c20   :  { %3430 = vmatpush3.msra.mxu1 %v4129_v39 }
0x1c21   :  { %3431 = vmatprep.subr.mxu1 %v4576_v43 }
0x1c22   :  { %3432 = vmatpush3.msra.mxu1 %v4136_v40 }
0x1c23   :  { %3433 = vmatprep.subr.mxu1 %v4576_v43 }
0x1c24   :  { %3434 = vmatpush3.msra.mxu1 %v4143_v22  ;;  %v3551_v22 = vld [vmem:[#allocation5] sm:$0xff] }
0x1c25   :  { %3435 = vmatprep.subr.mxu1 %v4576_v43 }
0x1c26   :  { %3436 = vmatpush3.msra.mxu1 %v4150_v23 }
0x1c27   :  { %3437 = vmatprep.subr.mxu1 %v4576_v43 }
0x1c28   :  { %3438 = vmatpush3.msra.mxu1 %v4170_v27  ;;  %v3552_v27 = vld [vmem:[%s4553_s6] ss:$0 sm:$0xff]  ;;  %s3653_s6 = smov 16  }
0x1c29   :  { %3439 = vmatprep.subr.mxu1 %v4576_v43 }
0x1c2a   :  { %3440 = vmatpush3.msra.mxu1 %v4177_v38 }
0x1cbb   :  { %v2392_v13 = vpop.f32.mrf.mxu0 }
0x1cbd   :  { %v3368_v14 = vpop.f32.mrf.mxu0 }
0x1cbe   :  { %v2833_v14 = vsub.s32 1, %v4582_v42 }
0x1cc3   :  { %v2465_v16 = vpop.f32.mrf.mxu1 }
0x1cc4   :  { %v2471_v17 = vcombine.low %v2392_v13, %v2465_v16 }
0x1cc5   :  { %v3375_v24 = vpop.f32.mrf.mxu1 }
0x1cc6   :  { %3385 = vmatmul.mubr.msk.f32.vlgmr.msra.gmra.mxu0 %vm157_vm0, %v2471_v17 }
0x1cc7   :  { %3399 = vmatpush3.msra.mxu0 %v3547_v28  ;;  %3406 = vmatprep.mubr.msk.f32.mxu0 %vm3650_vm1, %v4576_v43 }
0x1cc8   :  { %3400 = vmatprep.subr.mxu0 %v4576_v43 }
0x1cc9   :  { %3401 = vmatpush3.msra.mxu0 %v3548_v31 }
0x1cca   :  { %3402 = vmatprep.subr.mxu0 %v4576_v43 }
0x1ccb   :  { %v2612_v35 = vpop.f32.mrf.mxu1  ;;  %3403 = vmatpush3.msra.mxu0 %v3549_v36 }
0x1ccc   :  { %v2613_v39 = vadd.f32 %v3550_v37, %v2612_v35  ;;  %3404 = vmatprep.subr.mxu0 %v4576_v43 }
0x1ccd   :  { %v3397_v40 = vpop.f32.mrf.mxu1  ;;  %3405 = vmatpush3.msra.mxu0 %v3551_v22  ;;  %v2855_v22 = vsub.s32 3, %v4582_v42 }
0x1cce   :  { %2624 = vrot.lane.b32.xlu1 %v2613_v39, %s3642_s28 }
0x1d40   :  { %v2625_v43 = vpop.permute.xlu1 %2624 }
0x1d86   :  { %v2540_v23 = vpop.f32.mrf.mxu0 }
0x1d87   :  { %v2541_v38 = vadd.f32 %v3552_v27, %v2540_v23 }
0x1d88   :  { %v3386_v55 = vpop.f32.mrf.mxu0 }
0x1d89   :  { %v2616_v32 = vadd.f32 %v2613_v39, %v2541_v38 }
0x1d8b   :  { %v2952_v33 = vmul.f32 -1.442695, %v2616_v32 }
0x1d8d   :  { %3527 = vpow2.f32 %v2952_v33 }
0x1d9a   :  { %v3528_v34 = vpop.eup %3527 }
0x1d9b   :  { %v2620_v19 = vadd.f32 1.0, %v3528_v34 }
0x1d9d   :  { %3529 = vrcp.f32 %v2620_v19 }
0x1daa   :  { %v3530_v57 = vpop.eup %3529 }
0x1dab   :  { %v2627_v47 = vmul.f32 %v3530_v57, %v2625_v43  ;;  %v2634_v10 = vsub.f32 1.0, %v3530_v57  ;;  %v2640_v45 = vmul.f32 %v3530_v57, %v4365_v56 }
0x1dad   :  { %2629 = vrot.lane.b32.xlu0 %v2627_v47, %s3642_s28 }
0x1e1f   :  { %v2630_v46 = vpop.permute.xlu0 %2629 }
0x1e20   :  { %v2632_v4 = vadd.f32 %v2630_v46, %v2541_v38 }
0x1e22   :  { %3531 = vtanh.f32 %v2632_v4 }
0x1e2f   :  { %v3532_v58 = vpop.eup %3531 }
0x1e30   :  { %2636 = vrot.lane.b32.xlu0 %v3532_v58, %s3651_s14 }
0x1ea2   :  { %v2637_v48 = vpop.permute.xlu0 %2636 }
0x1ea3   :  { %v2639_v50 = vmul.f32 %v2637_v48, %v2634_v10 }
0x1ea5   :  { %v2641_v51 = vadd.f32 %v2640_v45, %v2639_v50 }
0x1ea7   :  { %2643 = vrot.lane.b32.xlu0 %v2641_v51, %s3651_s14 }
0x1f19   :  { %v2644_v52 = vpop.permute.xlu0 %2643 }
0x1f1a   :  { %v2646_v53 = vsel %vm157_vm0, %v2644_v52, 0.0 }
0x1f1b   :  { %2647 = vadd.xlane.f32.xlu0 %v2646_v53 }
0x1fa4   :  { %v2648_v1 = vpop.xlane.xlu0 %2647 }
0x1fa5   :  { %v2649_v2 = vmul.f32 0.03125, %v2648_v1 }
0x1fa7   :  { %v2650_v5 = vsub.f32 %v2641_v51, %v2649_v2 }
0x1fa9   :  { %v2651_v0 = vmul.f32 %v2650_v5, %v2650_v5 }
0x1fab   :  { %2653 = vrot.lane.b32.xlu1 %v2651_v0, %s3651_s14 }
0x201d   :  { %v2654_v11 = vpop.permute.xlu1 %2653 }
0x201e   :  { %v2656_v7 = vsel %vm157_vm0, %v2654_v11, 0.0 }
0x201f   :  { %2657 = vadd.xlane.f32.xlu1 %v2656_v7 }
0x20a8   :  { %v2658_v30 = vpop.xlane.xlu1 %2657 }
0x20a9   :  { %v2659_v56 = vmul.f32 0.03125, %v2658_v30 }
0x20ab   :  { %v2660_v6 = vadd.f32 1e-05, %v2659_v56 }
0x20ad   :  { %3533 = vrsqrt.f32 %v2660_v6 }
0x20ba   :  { %v3534_v54 = vpop.eup %3533 }
0x20bb   :  { %v2662_v63 = vmul.f32 %v3534_v54, %v2650_v5 }
0x20bd   :  { %v2663_v9 = vmul.f32 %v2662_v63, %v4076_v21 }
0x20bf   :  { %v2664_v62 = vadd.f32 %v2663_v9, %v4085_v26 }
0x20c1   :  { %2666 = vrot.lane.b32.xlu0 %v2664_v62, %s3651_s14 }
0x20c5   :  { %2290 = vrot.lane.b32.xlu0 %v4410_v3, %s3653_s6 }
0x2133   :  { %v2667_v59 = vpop.permute.xlu0 %2666 }
0x2134   :  { %3407 = vmatmul.mubr.msk.f32.vlgmr.msra.gmra.mxu0 %vm157_vm0, %v2667_v59 }
0x2137   :  { %v2291_v20 = vpop.permute.xlu0 %2290 }
0x2138   :  { %v2305_v17 = vsel %vm686_vm3, %v4414_v60, %v2291_v20 }
0x21f4   :  { %v2736_v49 = vpop.f32.mrf.mxu0 }
0x21f5   :  { %v2737_v15 = vadd.f32 %v4184_v41, %v2736_v49  ;;  %v2821_v41 = vsub.s32 0, %v4582_v42 }
0x21f6   :  { %v3408_v44 = vpop.f32.mrf.mxu0 }
0x21f7   :  { %v2740_v29 = vmax.f32 %v2737_v15, 0.0 }
0x21f9   :  { %3442 = vmatmul.mubr.f32.vlgmr.msra.gmra.mxu1 %v2740_v29 }
0x22b9   :  { %v2807_v12 = vpop.f32.mrf.mxu1 }
0x22ba   :  { %2812 = vrot.lane.b32.xlu1 %v2807_v12, %s3652_s15 }
0x22bb   :  { %v3443_v21 = vpop.f32.mrf.mxu1 }
0x22be   :  { %2296 = vrot.lane.b32.xlu1 %v4417_v18, %s3652_s15  ;;  %v2843_v18 = vsub.s32 2, %v4582_v42 }
0x22c2   :  { %2302 = vrot.lane.b32.xlu1 %v4420_v8, %s3654_s18 }
0x232c   :  { %v2813_v26 = vpop.permute.xlu1 %2812 }
0x232d   :  { %v2815_v3 = vadd.f32 %v2813_v26, %v2641_v51 }
0x232f   :  { %v2816_v25 = vadd.f32 %v2815_v3, %v4198_v61 }
0x2330   :  { %v2297_v13 = vpop.permute.xlu1 %2296 }
0x2331   :  { %v2818_v16 = vcombine.high %v2816_v25, %v2816_v25  ;;  %v2822_v8 = vrot.slane %v2816_v25, %v2821_v41  ;;  %v2306_v61 = vsel %vm157_vm0, %v2305_v17, %v2297_v13  ;;  %v2834_v35 = vrot.slane %v2816_v25, %v2833_v14 }
0x2332   :  { %v2844_v40 = vrot.slane %v2816_v25, %v2843_v18 }
0x2333   :  { %v2826_v24 = vrot.slane %v2818_v16, %v2821_v41  ;;  %v2838_v28 = vrot.slane %v2818_v16, %v2833_v14  ;;  %v2848_v39 = vrot.slane %v2818_v16, %v2843_v18 }
0x2334   :  { %v2303_v31 = vpop.permute.xlu1 %2302 }
0x2335   :  { %v2308_v36 = vsel %vm2307_vm5, %v2306_v61, %v2303_v31  ;;  %v2827_v37 = vsel %vm2285_vm4, %v2826_v24, %v2822_v8  ;;  %v2839_v60 = vsel %vm2285_vm4, %v2838_v28, %v2834_v35 }
0x2336   :  { %2828 = vrot.lane.b32.xlu0 %v2827_v37, %s3651_s14  ;;  %2310 = vst.msk [vmem:[#allocation8] sm:$0x3] %vm2309_vm6, %v2308_v36 }
0x2337   :  { %3604 = shalt.err (!%p3601_p0)
}
0x2338   :  { %2890 = dma.vmem_to_hbm [thread:$0]  %s2888_s19, 32, %s4560_s13, [#allocation9]   ;;  %v2849_v23 = vsel %vm2285_vm4, %v2848_v39, %v2844_v40  ;;  %v2860_v27 = vrot.slane %v2818_v16, %v2855_v22  ;;  %v2856_v38 = vrot.slane %v2816_v25, %v2855_v22  ;;  %vm2866_vm7 = vcmask 523264  }
0x2339   :  { %s3656_s14 = smov [#allocation7]   ;;  %vm2868_vm8 = vcmask 785408  }
0x233a   :  { %2850 = vrot.lane.b32.xlu0 %v2849_v23, %s3652_s15  ;;  %v2861_v55 = vsel %vm2285_vm4, %v2860_v27, %v2856_v38  ;;  %s2877_s1 = sshll.u32 %s3656_s14, 4  ;;  %s2878_s1 = int_to_ptr.vmem [resolvable:$true] %s2877_s1 }
0x233b   :  { %s3613_s13 = scalar_lea.vmem %s2878_s1, 32  ;;  %p3618_p2 = scmp.lt.s32.totalorder %s2878_s1, %s2878_s1 }
0x233c   :  { %p3614_p1 = scmp.ne.s32.totalorder %s2878_s1, %s3613_s13  ;;  %p3619_p3 = scmp.lt.s32.totalorder %s3613_s13, %s3613_s13 }
0x233e   :  { %2862 = vrot.lane.b32.xlu0 %v2861_v55, %s3642_s28  ;;  %p3620_p4 = por %p3619_p3, %p3618_p2 }
0x2340   :  { %p3621_p5 = pnand %p3620_p4, %p3614_p1 }
0x23a8   :  { %v2829_v32 = vpop.permute.xlu0 %2828 }
0x23a9   :  { %v2865_v34 = vsel %vm157_vm0, %v2829_v32, %v2839_v60 }
0x23ac   :  { %v2851_v33 = vpop.permute.xlu0 %2850 }
0x23ad   :  { %v2867_v19 = vsel %vm2866_vm7, %v2865_v34, %v2851_v33 }
0x23b0   :  { %v2863_v57 = vpop.permute.xlu0 %2862 }
0x23b1   :  { %v2869_v43 = vsel %vm2868_vm8, %v2867_v19, %v2863_v57 }
0x23b2   :  { %2870 = vst [vmem:[#allocation7] sm:$0x3] %v2869_v43 }
0x23b3   :  { %3624 = shalt.err (!%p3621_p5)
}
0x23b4   :  { %2880 = dma.vmem_to_hbm [thread:$0]  %s2878_s1, 32, %s4559_s12, [#allocation4]  }
0x23b5   :  { %3637 = dma.done.wait [#allocation4], 32  }
0x23b6   :  { %3638 = vsyncadd [#allocation4], 4294967264 }
0x23b7   :  { %3639 = dma.done.wait [#allocation9], 32  }
0x23b8   :  { %3640 = vsyncadd [#allocation9], 4294967264 }
0x23b9   :  { %2897 = vsyncpa [#allocation3], 1 }
0x23ba   :  { %2898 = vsyncpa [#allocation6], 1 }
0x23bb   :  { %2899 = vsyncpa [#allocation4], 1 }
0x23bc   :  { %2900 = vsyncpa [#allocation9], 1 }

</bundles_post_ra>
